<compile_context>
chip_gen: v5e
topology: v5e:2x2
jax: 0.10.0
libtpu: 0.0.40
codegen_flags: <defaults>
</compile_context>

<pallas_src>
import functools

import jax
import jax.numpy as jnp
from jax import lax
from jax.experimental import pallas as pl
from jax.experimental.pallas import tpu as pltpu

_INV_SQRT2 = 0.7071067811865476


def _precise_recip(x):
    # Approximate EUP reciprocal seed + 2 Newton-Raphson refinements -> ~f32-accurate 1/x.
    r = pl.reciprocal(x, approx=True)
    r = r * (2.0 - x * r)
    r = r * (2.0 - x * r)
    return r


def _gelu_exact(x):
    # Exact-GELU semantics via Abramowitz & Stegun 7.1.26 erf polynomial (|err_erf| ~ 1.5e-7).
    # One exp per element; the divide is a NR-refined reciprocal (accurate, still EUP-seeded).
    u = x * _INV_SQRT2
    au = jnp.abs(u)
    t = _precise_recip(1.0 + 0.3275911 * au)
    poly = ((((1.061405429 * t - 1.453152027) * t + 1.421413741) * t
             - 0.284496736) * t + 0.254829592) * t
    erf_au = 1.0 - poly * jnp.exp(-au * au)
    erf_u = jnp.where(u >= 0.0, erf_au, -erf_au)
    return 0.5 * x * (1.0 + erf_u)


def block_kernel(x_ref, pc_ref, w1_ref, b1_ref, w2_ref, b2_ref, o_ref, *,
                 eps, width, bt):
    """One grid step = `bt` images. x_ref block: (bt, C, H*W), channels-first, spatial on lanes."""
    # ---- per-step constants, hoisted above the per-image loop --------------------------------
    inv_cnt = pc_ref[0:1, :]                 # 1 / (#valid 3x3 neighbours)   (1, T)
    colf = pc_ref[1:2, :]                    # spatial column index (f32)    (1, T)
    rowf = pc_ref[2:3, :]                    # spatial row index (f32)       (1, T)
    T = colf.shape[1]

    def shift_mask(payload, shift):
        # {0,1} validity mask for a lane rotation by `shift`: the arriving element is a genuine
        # 3x3 neighbour iff its col/row index differs from the destination's by exactly 1.
        # Derived from the SAME roll so it is correct regardless of the roll direction convention.
        rp = pltpu.roll(payload, shift, axis=1)
        return jnp.where(jnp.abs(payload - rp) == 1.0, 1.0, 0.0)

    m_l = shift_mask(colf, 1)                # horizontal neighbour masks
    m_r = shift_mask(colf, T - 1)
    m_u = shift_mask(rowf, width)            # vertical neighbour masks (applied to row sums)
    m_d = shift_mask(rowf, T - width)

    w1 = w1_ref[...]                         # (4C, C)  LN affine folded in
    b1 = b1_ref[...]                         # (4C, 1)
    w2 = w2_ref[...]                         # (C, 4C)  layer scale folded in
    b2 = b2_ref[...]                         # (C, 1)

    # ---- per-image work (static unrolled loop; bt is small) ----------------------------------
    for i in range(bt):
        x = x_ref[i]                         # (C, T) float32

        # token mixer: AvgPool2d(3, stride=1, pad=1, count_include_pad=False)(x) - x
        # separable 3-tap sums; shifts are lane rotations on the XLU, edges via masks.
        sw = (x
              + pltpu.roll(x, 1, axis=1) * m_l
              + pltpu.roll(x, T - 1, axis=1) * m_r)
        s = (sw
             + pltpu.roll(sw, width, axis=1) * m_u
             + pltpu.roll(sw, T - width, axis=1) * m_d)
        mixed = s * inv_cnt - x

        # LayerNorm over channels (axis 0), two-pass variance + exact 1/sqrt.
        # (affine weight/bias already folded into w1/b1 by the wrapper)
        mu = jnp.mean(mixed, axis=0, keepdims=True)
        d = mixed - mu
        var = jnp.mean(d * d, axis=0, keepdims=True)
        z = d * _precise_recip(jnp.sqrt(var + eps))

        # MLP (channels-first): h = W1eff z ; GELU ; y = W2eff h
        h = jnp.dot(w1, z, preferred_element_type=jnp.float32) + b1
        h = _gelu_exact(h)
        y = jnp.dot(w2, h, preferred_element_type=jnp.float32) + b2

        # residual (drop_path = Identity)
        o_ref[i] = x + y


def _pick_batch_tile(B):
    # Amortize the ~0.35us per-grid-step overhead over several images, but keep >=2 grid steps
    # whenever B >= 2 so both TensorCores get work on v7x.
    for bt in (8, 4, 2, 1):
        if B % bt == 0 and (B // bt >= 2 or B == 1):
            return bt
    return 1


def block_forward(x_nchw, params, eps=1e-6):
    lnw, lnb, w1, b1, w2, b2, gamma = params
    B, C, H, W = x_nchw.shape
    assert H >= 3 and W >= 3, "3x3 pool path assumes H, W >= 3"
    T = H * W
    # TODO(synk): for H*W not a multiple of 128, pad T (with masked pool constants) to keep
    # lane-dense unmasked stores; T=256 here is already lane-dense.
    x2 = x_nchw.reshape(B, C, T).astype(jnp.float32)     # free reshape (contiguous minor dims)

    # Fold LayerNorm affine into pwconv1 and layer scale into pwconv2; pre-transpose to
    # channels-first (out_features, in_features).
    w1t = (w1 * lnw[:, None]).T.astype(jnp.float32)       # (4C, C)
    b1f = (b1 + lnb @ w1)[:, None].astype(jnp.float32)    # (4C, 1)
    w2t = (w2 * gamma[None, :]).T.astype(jnp.float32)     # (C, 4C)
    b2f = (b2 * gamma)[:, None].astype(jnp.float32)       # (C, 1)

    # Grid-invariant pool constants: 1/count (count_include_pad=False), col idx, row idx.
    idx = jnp.arange(T)
    col = (idx % W).astype(jnp.float32)
    row = (idx // W).astype(jnp.float32)
    cc = 3.0 - (col == 0).astype(jnp.float32) - (col == W - 1).astype(jnp.float32)
    rc = 3.0 - (row == 0).astype(jnp.float32) - (row == H - 1).astype(jnp.float32)
    inv_cnt = 1.0 / (rc * cc)
    pconst = jnp.zeros((8, T), jnp.float32).at[0].set(inv_cnt).at[1].set(col).at[2].set(row)

    Bt = _pick_batch_tile(B)
    steps = B // Bt

    # Tight VMEM request (~3x working set, 8 MiB floor) instead of a 32 MiB blanket claim.
    block_bytes = 4 * Bt * C * T                       # one x/out block
    const_bytes = 4 * (8 * T + 8 * C * C + 5 * C)      # pool consts + folded weights/biases
    tmp_bytes = 4 * (14 * C * T)                       # elementwise/matmul temporaries (bound)
    est = 4 * block_bytes + 2 * const_bytes + tmp_bytes
    vmem_limit = int(min(max(3 * est, 8 << 20), 64 << 20))

    cost = pl.CostEstimate(
        flops=int(B * (16 * T * C * C + 60 * T * C)),
        transcendentals=int(B * T * 4 * C),
        bytes_accessed=int(4 * (2 * B * C * T + 8 * C * C + 8 * T + 5 * C)),
    )

    kern = functools.partial(block_kernel, eps=eps, width=W, bt=Bt)
    out = pl.pallas_call(
        kern,
        out_shape=jax.ShapeDtypeStruct((B, C, T), jnp.float32),
        grid_spec=pltpu.PrefetchScalarGridSpec(
            num_scalar_prefetch=0,
            grid=(steps,),
            in_specs=[
                pl.BlockSpec((Bt, C, T), lambda b: (b, 0, 0)),   # x (channels-first, flat)
                pl.BlockSpec((8, T), lambda b: (0, 0)),          # pool constants
                pl.BlockSpec((4 * C, C), lambda b: (0, 0)),      # W1eff (LN folded)
                pl.BlockSpec((4 * C, 1), lambda b: (0, 0)),      # b1eff
                pl.BlockSpec((C, 4 * C), lambda b: (0, 0)),      # W2eff (gamma folded)
                pl.BlockSpec((C, 1), lambda b: (0, 0)),          # b2eff
            ],
            out_specs=pl.BlockSpec((Bt, C, T), lambda b: (b, 0, 0)),
        ),
        compiler_params=pltpu.CompilerParams(
            dimension_semantics=("parallel",),
            vmem_limit_bytes=vmem_limit,
        ),
        cost_estimate=cost,
    )(x2, pconst, w1t, b1f, w2t, b2f)
    return out.reshape(B, C, H, W)


def ref_forward(x_nchw, params, eps=1e-6):
    # Pure-JAX reference (independent of the kernel's formulation), NCHW in/out.
    lnw, lnb, w1, b1, w2, b2, gamma = params
    x = jnp.transpose(x_nchw, (0, 2, 3, 1))
    win, strides = (1, 3, 3, 1), (1, 1, 1, 1)
    s = lax.reduce_window(x, 0.0, lax.add, win, strides, 'SAME')
    cnt = lax.reduce_window(jnp.ones_like(x), 0.0, lax.add, win, strides, 'SAME')
    mixed = s / cnt - x
    mu = mixed.mean(-1, keepdims=True)
    var = ((mixed - mu) ** 2).mean(-1, keepdims=True)
    xn = (mixed - mu) / jnp.sqrt(var + eps) * lnw + lnb
    h = xn @ w1 + b1
    h = 0.5 * h * (1.0 + lax.erf(h * _INV_SQRT2))
    y = (h @ w2 + b2) * gamma
    return jnp.transpose(x + y, (0, 3, 1, 2))


if __name__ == "__main__":
    B, C, H, W = 2, 32, 16, 16
    key = jax.random.PRNGKey(0)
    k = jax.random.split(key, 8)
    x = jax.random.normal(k[0], (B, C, H, W), jnp.float32)

    # Deterministic synthetic parameters (shapes per the module's __init__).
    lnw = 1.0 + 0.1 * jax.random.normal(k[1], (C,), jnp.float32)
    lnb = 0.1 * jax.random.normal(k[2], (C,), jnp.float32)
    w1 = jax.random.normal(k[3], (C, 4 * C), jnp.float32) / jnp.sqrt(float(C))
    b1 = 0.1 * jax.random.normal(k[4], (4 * C,), jnp.float32)
    w2 = jax.random.normal(k[5], (4 * C, C), jnp.float32) / jnp.sqrt(float(4 * C))
    b2 = 0.1 * jax.random.normal(k[6], (C,), jnp.float32)
    # Module init is layer_scale_init_value*ones (1e-6); randomized so the MLP branch
    # contributes non-trivially to the numerical check.
    gamma = 0.5 * jax.random.normal(k[7], (C,), jnp.float32)
    params = (lnw, lnb, w1, b1, w2, b2, gamma)

    fwd = jax.jit(block_forward)
    out = jax.block_until_ready(fwd(x, params))
    ref = ref_forward(x, params)
    assert out.shape == x.shape and out.dtype == jnp.float32
    max_err = float(jnp.max(jnp.abs(out - ref)))
    assert max_err < 1e-3, f"max abs err {max_err}"
    print("KERNEL_OK")
</pallas_src>

<mosaic_0001>
module attributes {stable_mosaic.version = 11 : i64} {
  func.func @block_kernel(%arg0: i32, %arg1: memref<1x32x256xf32, #tpu.memory_space<vmem>>, %arg2: memref<8x256xf32, #tpu.memory_space<vmem>>, %arg3: memref<128x32xf32, #tpu.memory_space<vmem>>, %arg4: memref<128x1xf32, #tpu.memory_space<vmem>>, %arg5: memref<32x128xf32, #tpu.memory_space<vmem>>, %arg6: memref<32x1xf32, #tpu.memory_space<vmem>>, %arg7: memref<1x32x256xf32, #tpu.memory_space<vmem>>) attributes {dimension_semantics = [#tpu.dimension_semantics<parallel>], iteration_bounds = array<i64: 2>, scalar_prefetch = 0 : i64, scratch_operands = 0 : i64, tpu.core_type = #tpu.core_type<tc>, window_params = [{transform_indices = @transform_0, window_bounds = array<i64: 1, 32, 256>}, {pipeline_mode = #tpu.pipeline_mode<synchronous>, transform_indices = @transform_1, window_bounds = array<i64: 8, 256>}, {pipeline_mode = #tpu.pipeline_mode<synchronous>, transform_indices = @transform_2, window_bounds = array<i64: 128, 32>}, {pipeline_mode = #tpu.pipeline_mode<synchronous>, transform_indices = @transform_3, window_bounds = array<i64: 128, 1>}, {pipeline_mode = #tpu.pipeline_mode<synchronous>, transform_indices = @transform_4, window_bounds = array<i64: 32, 128>}, {pipeline_mode = #tpu.pipeline_mode<synchronous>, transform_indices = @transform_5, window_bounds = array<i64: 32, 1>}, {transform_indices = @transform_6, window_bounds = array<i64: 1, 32, 256>}]} {
    %c0 = arith.constant 0 : index
    %c0_0 = arith.constant 0 : index
    %0 = vector.load %arg2[%c0, %c0_0] : memref<8x256xf32, #tpu.memory_space<vmem>>, vector<1x256xf32>
    %c1 = arith.constant 1 : index
    %c0_1 = arith.constant 0 : index
    %1 = vector.load %arg2[%c1, %c0_1] : memref<8x256xf32, #tpu.memory_space<vmem>>, vector<1x256xf32>
    %c2 = arith.constant 2 : index
    %c0_2 = arith.constant 0 : index
    %2 = vector.load %arg2[%c2, %c0_2] : memref<8x256xf32, #tpu.memory_space<vmem>>, vector<1x256xf32>
    %c1_i32 = arith.constant 1 : i32
    %3 = tpu.dynamic_rotate %1 by %c1_i32 dim 1 : vector<1x256xf32>, i32 -> vector<1x256xf32>
    %4 = arith.subf %1, %3 : vector<1x256xf32>
    %5 = math.absf %4 : vector<1x256xf32>
    %cst = arith.constant 1.000000e+00 : f32
    %6 = vector.broadcast %cst : f32 to vector<1x256xf32>
    %7 = arith.cmpf oeq, %5, %6 : vector<1x256xf32>
    %cst_3 = arith.constant 1.000000e+00 : f32
    %cst_4 = arith.constant 0.000000e+00 : f32
    %8 = vector.broadcast %cst_3 : f32 to vector<1x256xf32>
    %9 = vector.broadcast %cst_4 : f32 to vector<1x256xf32>
    %10 = arith.select %7, %8, %9 : vector<1x256xi1>, vector<1x256xf32>
    %c255_i32 = arith.constant 255 : i32
    %11 = tpu.dynamic_rotate %1 by %c255_i32 dim 1 : vector<1x256xf32>, i32 -> vector<1x256xf32>
    %12 = arith.subf %1, %11 : vector<1x256xf32>
    %13 = math.absf %12 : vector<1x256xf32>
    %cst_5 = arith.constant 1.000000e+00 : f32
    %14 = vector.broadcast %cst_5 : f32 to vector<1x256xf32>
    %15 = arith.cmpf oeq, %13, %14 : vector<1x256xf32>
    %cst_6 = arith.constant 1.000000e+00 : f32
    %cst_7 = arith.constant 0.000000e+00 : f32
    %16 = vector.broadcast %cst_6 : f32 to vector<1x256xf32>
    %17 = vector.broadcast %cst_7 : f32 to vector<1x256xf32>
    %18 = arith.select %15, %16, %17 : vector<1x256xi1>, vector<1x256xf32>
    %c16_i32 = arith.constant 16 : i32
    %19 = tpu.dynamic_rotate %2 by %c16_i32 dim 1 : vector<1x256xf32>, i32 -> vector<1x256xf32>
    %20 = arith.subf %2, %19 : vector<1x256xf32>
    %21 = math.absf %20 : vector<1x256xf32>
    %cst_8 = arith.constant 1.000000e+00 : f32
    %22 = vector.broadcast %cst_8 : f32 to vector<1x256xf32>
    %23 = arith.cmpf oeq, %21, %22 : vector<1x256xf32>
    %cst_9 = arith.constant 1.000000e+00 : f32
    %cst_10 = arith.constant 0.000000e+00 : f32
    %24 = vector.broadcast %cst_9 : f32 to vector<1x256xf32>
    %25 = vector.broadcast %cst_10 : f32 to vector<1x256xf32>
    %26 = arith.select %23, %24, %25 : vector<1x256xi1>, vector<1x256xf32>
    %c240_i32 = arith.constant 240 : i32
    %27 = tpu.dynamic_rotate %2 by %c240_i32 dim 1 : vector<1x256xf32>, i32 -> vector<1x256xf32>
    %28 = arith.subf %2, %27 : vector<1x256xf32>
    %29 = math.absf %28 : vector<1x256xf32>
    %cst_11 = arith.constant 1.000000e+00 : f32
    %30 = vector.broadcast %cst_11 : f32 to vector<1x256xf32>
    %31 = arith.cmpf oeq, %29, %30 : vector<1x256xf32>
    %cst_12 = arith.constant 1.000000e+00 : f32
    %cst_13 = arith.constant 0.000000e+00 : f32
    %32 = vector.broadcast %cst_12 : f32 to vector<1x256xf32>
    %33 = vector.broadcast %cst_13 : f32 to vector<1x256xf32>
    %34 = arith.select %31, %32, %33 : vector<1x256xi1>, vector<1x256xf32>
    %c0_14 = arith.constant 0 : index
    %c0_15 = arith.constant 0 : index
    %35 = vector.load %arg3[%c0_14, %c0_15] : memref<128x32xf32, #tpu.memory_space<vmem>>, vector<128x32xf32>
    %c0_16 = arith.constant 0 : index
    %c0_17 = arith.constant 0 : index
    %36 = vector.load %arg4[%c0_16, %c0_17] : memref<128x1xf32, #tpu.memory_space<vmem>>, vector<128x1xf32>
    %c0_18 = arith.constant 0 : index
    %c0_19 = arith.constant 0 : index
    %37 = vector.load %arg5[%c0_18, %c0_19] : memref<32x128xf32, #tpu.memory_space<vmem>>, vector<32x128xf32>
    %c0_20 = arith.constant 0 : index
    %c0_21 = arith.constant 0 : index
    %38 = vector.load %arg6[%c0_20, %c0_21] : memref<32x1xf32, #tpu.memory_space<vmem>>, vector<32x1xf32>
    %c0_22 = arith.constant 0 : index
    %c0_23 = arith.constant 0 : index
    %c0_24 = arith.constant 0 : index
    %39 = vector.load %arg1[%c0_22, %c0_23, %c0_24] : memref<1x32x256xf32, #tpu.memory_space<vmem>>, vector<1x32x256xf32>
    %40 = vector.shape_cast %39 : vector<1x32x256xf32> to vector<32x256xf32>
    %c1_i32_25 = arith.constant 1 : i32
    %41 = tpu.dynamic_rotate %40 by %c1_i32_25 dim 1 : vector<32x256xf32>, i32 -> vector<32x256xf32>
    %42 = vector.broadcast %10 : vector<1x256xf32> to vector<32x256xf32>
    %43 = arith.mulf %41, %42 : vector<32x256xf32>
    %44 = arith.addf %40, %43 : vector<32x256xf32>
    %c255_i32_26 = arith.constant 255 : i32
    %45 = tpu.dynamic_rotate %40 by %c255_i32_26 dim 1 : vector<32x256xf32>, i32 -> vector<32x256xf32>
    %46 = vector.broadcast %18 : vector<1x256xf32> to vector<32x256xf32>
    %47 = arith.mulf %45, %46 : vector<32x256xf32>
    %48 = arith.addf %44, %47 : vector<32x256xf32>
    %c16_i32_27 = arith.constant 16 : i32
    %49 = tpu.dynamic_rotate %48 by %c16_i32_27 dim 1 : vector<32x256xf32>, i32 -> vector<32x256xf32>
    %50 = vector.broadcast %26 : vector<1x256xf32> to vector<32x256xf32>
    %51 = arith.mulf %49, %50 : vector<32x256xf32>
    %52 = arith.addf %48, %51 : vector<32x256xf32>
    %c240_i32_28 = arith.constant 240 : i32
    %53 = tpu.dynamic_rotate %48 by %c240_i32_28 dim 1 : vector<32x256xf32>, i32 -> vector<32x256xf32>
    %54 = vector.broadcast %34 : vector<1x256xf32> to vector<32x256xf32>
    %55 = arith.mulf %53, %54 : vector<32x256xf32>
    %56 = arith.addf %52, %55 : vector<32x256xf32>
    %57 = vector.broadcast %0 : vector<1x256xf32> to vector<32x256xf32>
    %58 = arith.mulf %56, %57 : vector<32x256xf32>
    %59 = arith.subf %58, %40 : vector<32x256xf32>
    %cst_29 = arith.constant dense<0.000000e+00> : vector<256xf32>
    %60 = vector.multi_reduction <add>, %59, %cst_29 [0] : vector<32x256xf32> to vector<256xf32>
    %61 = vector.shape_cast %60 : vector<256xf32> to vector<1x256xf32>
    %cst_30 = arith.constant 3.200000e+01 : f32
    %62 = vector.broadcast %cst_30 : f32 to vector<1x256xf32>
    %63 = arith.divf %61, %62 : vector<1x256xf32>
    %64 = vector.broadcast %63 : vector<1x256xf32> to vector<32x256xf32>
    %65 = arith.subf %59, %64 : vector<32x256xf32>
    %66 = arith.mulf %65, %65 : vector<32x256xf32>
    %cst_31 = arith.constant dense<0.000000e+00> : vector<256xf32>
    %67 = vector.multi_reduction <add>, %66, %cst_31 [0] : vector<32x256xf32> to vector<256xf32>
    %68 = vector.shape_cast %67 : vector<256xf32> to vector<1x256xf32>
    %cst_32 = arith.constant 3.200000e+01 : f32
    %69 = vector.broadcast %cst_32 : f32 to vector<1x256xf32>
    %70 = arith.divf %68, %69 : vector<1x256xf32>
    %cst_33 = arith.constant 9.99999997E-7 : f32
    %71 = vector.broadcast %cst_33 : f32 to vector<1x256xf32>
    %72 = arith.addf %70, %71 : vector<1x256xf32>
    %73 = math.sqrt %72 : vector<1x256xf32>
    %74 = tpu.reciprocal %73 {approx = true} : vector<1x256xf32> -> vector<1x256xf32>
    %75 = arith.mulf %73, %74 : vector<1x256xf32>
    %cst_34 = arith.constant 2.000000e+00 : f32
    %76 = vector.broadcast %cst_34 : f32 to vector<1x256xf32>
    %77 = arith.subf %76, %75 : vector<1x256xf32>
    %78 = arith.mulf %74, %77 : vector<1x256xf32>
    %79 = arith.mulf %73, %78 : vector<1x256xf32>
    %cst_35 = arith.constant 2.000000e+00 : f32
    %80 = vector.broadcast %cst_35 : f32 to vector<1x256xf32>
    %81 = arith.subf %80, %79 : vector<1x256xf32>
    %82 = arith.mulf %78, %81 : vector<1x256xf32>
    %83 = vector.broadcast %82 : vector<1x256xf32> to vector<32x256xf32>
    %84 = arith.mulf %65, %83 : vector<32x256xf32>
    %cst_36 = arith.constant dense<0.000000e+00> : vector<128x256xf32>
    %85 = tpu.matmul %35, %84, %cst_36 {dimension_numbers = #tpu.dot_dimension_numbers<[1], [0], [0], [1], [0, 0, 1, 1], [], []>} : vector<128x32xf32>, vector<32x256xf32>, vector<128x256xf32> -> vector<128x256xf32>
    %86 = vector.broadcast %36 : vector<128x1xf32> to vector<128x256xf32>
    %87 = arith.addf %85, %86 : vector<128x256xf32>
    %cst_37 = arith.constant 0.707106769 : f32
    %88 = vector.broadcast %cst_37 : f32 to vector<128x256xf32>
    %89 = arith.mulf %87, %88 : vector<128x256xf32>
    %90 = math.absf %89 : vector<128x256xf32>
    %cst_38 = arith.constant 0.327591091 : f32
    %91 = vector.broadcast %cst_38 : f32 to vector<128x256xf32>
    %92 = arith.mulf %91, %90 : vector<128x256xf32>
    %cst_39 = arith.constant 1.000000e+00 : f32
    %93 = vector.broadcast %cst_39 : f32 to vector<128x256xf32>
    %94 = arith.addf %93, %92 : vector<128x256xf32>
    %95 = tpu.reciprocal %94 {approx = true} : vector<128x256xf32> -> vector<128x256xf32>
    %96 = arith.mulf %94, %95 : vector<128x256xf32>
    %cst_40 = arith.constant 2.000000e+00 : f32
    %97 = vector.broadcast %cst_40 : f32 to vector<128x256xf32>
    %98 = arith.subf %97, %96 : vector<128x256xf32>
    %99 = arith.mulf %95, %98 : vector<128x256xf32>
    %100 = arith.mulf %94, %99 : vector<128x256xf32>
    %cst_41 = arith.constant 2.000000e+00 : f32
    %101 = vector.broadcast %cst_41 : f32 to vector<128x256xf32>
    %102 = arith.subf %101, %100 : vector<128x256xf32>
    %103 = arith.mulf %99, %102 : vector<128x256xf32>
    %cst_42 = arith.constant 1.06140542 : f32
    %104 = vector.broadcast %cst_42 : f32 to vector<128x256xf32>
    %105 = arith.mulf %104, %103 : vector<128x256xf32>
    %cst_43 = arith.constant 1.45315206 : f32
    %106 = vector.broadcast %cst_43 : f32 to vector<128x256xf32>
    %107 = arith.subf %105, %106 : vector<128x256xf32>
    %108 = arith.mulf %107, %103 : vector<128x256xf32>
    %cst_44 = arith.constant 1.42141378 : f32
    %109 = vector.broadcast %cst_44 : f32 to vector<128x256xf32>
    %110 = arith.addf %108, %109 : vector<128x256xf32>
    %111 = arith.mulf %110, %103 : vector<128x256xf32>
    %cst_45 = arith.constant 0.284496725 : f32
    %112 = vector.broadcast %cst_45 : f32 to vector<128x256xf32>
    %113 = arith.subf %111, %112 : vector<128x256xf32>
    %114 = arith.mulf %113, %103 : vector<128x256xf32>
    %cst_46 = arith.constant 0.254829586 : f32
    %115 = vector.broadcast %cst_46 : f32 to vector<128x256xf32>
    %116 = arith.addf %114, %115 : vector<128x256xf32>
    %117 = arith.mulf %116, %103 : vector<128x256xf32>
    %cst_47 = arith.constant 0.000000e+00 : f32
    %118 = vector.broadcast %cst_47 : f32 to vector<128x256xf32>
    %119 = arith.subf %118, %90 : vector<128x256xf32>
    %120 = arith.mulf %119, %90 : vector<128x256xf32>
    %121 = math.exp %120 : vector<128x256xf32>
    %122 = arith.mulf %117, %121 : vector<128x256xf32>
    %cst_48 = arith.constant 1.000000e+00 : f32
    %123 = vector.broadcast %cst_48 : f32 to vector<128x256xf32>
    %124 = arith.subf %123, %122 : vector<128x256xf32>
    %cst_49 = arith.constant 0.000000e+00 : f32
    %125 = vector.broadcast %cst_49 : f32 to vector<128x256xf32>
    %126 = arith.cmpf oge, %89, %125 : vector<128x256xf32>
    %cst_50 = arith.constant 0.000000e+00 : f32
    %127 = vector.broadcast %cst_50 : f32 to vector<128x256xf32>
    %128 = arith.subf %127, %124 : vector<128x256xf32>
    %129 = arith.select %126, %124, %128 : vector<128x256xi1>, vector<128x256xf32>
    %cst_51 = arith.constant 5.000000e-01 : f32
    %130 = vector.broadcast %cst_51 : f32 to vector<128x256xf32>
    %131 = arith.mulf %130, %87 : vector<128x256xf32>
    %cst_52 = arith.constant 1.000000e+00 : f32
    %132 = vector.broadcast %cst_52 : f32 to vector<128x256xf32>
    %133 = arith.addf %132, %129 : vector<128x256xf32>
    %134 = arith.mulf %131, %133 : vector<128x256xf32>
    %cst_53 = arith.constant dense<0.000000e+00> : vector<32x256xf32>
    %135 = tpu.matmul %37, %134, %cst_53 {dimension_numbers = #tpu.dot_dimension_numbers<[1], [0], [0], [1], [0, 0, 1, 1], [], []>} : vector<32x128xf32>, vector<128x256xf32>, vector<32x256xf32> -> vector<32x256xf32>
    %136 = vector.broadcast %38 : vector<32x1xf32> to vector<32x256xf32>
    %137 = arith.addf %135, %136 : vector<32x256xf32>
    %138 = arith.addf %40, %137 : vector<32x256xf32>
    %c0_54 = arith.constant 0 : index
    %c0_55 = arith.constant 0 : index
    %c0_56 = arith.constant 0 : index
    %139 = vector.load %arg7[%c0_54, %c0_55, %c0_56] : memref<1x32x256xf32, #tpu.memory_space<vmem>>, vector<1x32x256xf32>
    %140 = vector.shape_cast %139 : vector<1x32x256xf32> to vector<32x256xf32>
    %141 = vector.shape_cast %138 : vector<32x256xf32> to vector<1x32x256xf32>
    tpu.vector_store %arg7[%c0_54, %c0_55, %c0_56], %141 {strides = array<i32>} : memref<1x32x256xf32, #tpu.memory_space<vmem>>, vector<1x32x256xf32>,
    return
  }
  func.func @transform_0(%arg0: i32) -> (i32, i32, i32) {
    %c0_i32 = arith.constant 0 : i32
    %c0_i32_0 = arith.constant 0 : i32
    %c0_i32_1 = arith.constant 0 : i32
    return %arg0, %c0_i32, %c0_i32_0 : i32, i32, i32
  }
  func.func @transform_1(%arg0: i32) -> (i32, i32) {
    %c0_i32 = arith.constant 0 : i32
    %c0_i32_0 = arith.constant 0 : i32
    %c0_i32_1 = arith.constant 0 : i32
    return %c0_i32, %c0_i32_0 : i32, i32
  }
  func.func @transform_2(%arg0: i32) -> (i32, i32) {
    %c0_i32 = arith.constant 0 : i32
    %c0_i32_0 = arith.constant 0 : i32
    %c0_i32_1 = arith.constant 0 : i32
    return %c0_i32, %c0_i32_0 : i32, i32
  }
  func.func @transform_3(%arg0: i32) -> (i32, i32) {
    %c0_i32 = arith.constant 0 : i32
    %c0_i32_0 = arith.constant 0 : i32
    %c0_i32_1 = arith.constant 0 : i32
    return %c0_i32, %c0_i32_0 : i32, i32
  }
  func.func @transform_4(%arg0: i32) -> (i32, i32) {
    %c0_i32 = arith.constant 0 : i32
    %c0_i32_0 = arith.constant 0 : i32
    %c0_i32_1 = arith.constant 0 : i32
    return %c0_i32, %c0_i32_0 : i32, i32
  }
  func.func @transform_5(%arg0: i32) -> (i32, i32) {
    %c0_i32 = arith.constant 0 : i32
    %c0_i32_0 = arith.constant 0 : i32
    %c0_i32_1 = arith.constant 0 : i32
    return %c0_i32, %c0_i32_0 : i32, i32
  }
  func.func @transform_6(%arg0: i32) -> (i32, i32, i32) {
    %c0_i32 = arith.constant 0 : i32
    %c0_i32_0 = arith.constant 0 : i32
    %c0_i32_1 = arith.constant 0 : i32
    return %arg0, %c0_i32, %c0_i32_0 : i32, i32, i32
  }
}

</mosaic_0001>

<bundles_post_ra>
// kernel: block_forward.1
= control target key start
LH: loop header
LB: loop body
LE: loop exit
PB: predicated region body
PF: predicated region fallthrough
CT: control target
= control target key end

     0   :  { %s2459_s21 = smov 0   ;;  %s3852_s0 = inlined_call_operand.vmem [shape: f32[2,32,256], index: 0, kind: input, shape index: {}]   ;;  %s3853_s1 = inlined_call_operand.vmem [shape: f32[8,256], index: 1, kind: input, shape index: {}]   ;;  %s3854_s2 = inlined_call_operand.vmem [shape: f32[128,32], index: 2, kind: input, shape index: {}]   ;;  %s3855_s3 = inlined_call_operand.vmem [shape: f32[128,1], index: 3, kind: input, shape index: {}]   ;;  %s3856_s4 = inlined_call_operand.vmem [shape: f32[32,128], index: 4, kind: input, shape index: {}]   ;;  %s3857_s5 = inlined_call_operand.vmem [shape: f32[32,1], index: 5, kind: input, shape index: {}]   ;;  %s3858_s6 = inlined_call_operand.vmem [shape: f32[2,32,256], index: 6, kind: output, shape index: {}]  }
   0x1 LB: > { %s2126_s22 = sadd.s32 4294967295, %s2415_s21   ;;  %p2130_p0 = scmp.ge.s32.totalorder %s2415_s21, 1  ;;  %s2415_s21 = sphi %s2459_s21, %s16_s21  }
   0x2   : > { %p212_p1 = scmp.lt.s32.totalorder %s2415_s21, 3 }
   0x4   : > { %p213_p2 = pnand %p2130_p0, %p212_p1 }
   0x6   : > { %216 = sbr.rel (%p213_p2) target bundleno = 992 (0x3e0), region = 44 }
   0xb   : > { %v2470_v0 = vld [vmem:[%s3853_s1 + $0x1] ss:$8 sm:$0x3]  ;;  %p242_p3 = scmp.lt.s32.totalorder %s2126_s22, 1  ;;  %s2417_s25 = smov 127   ;;  %v266_v16 = vlaneseq  ;;  %vm274_vm2 = vcmask 1040384  }
   0xc   : > { %v258_v1 = vperm.slane %v2470_v0, 0  ;;  %s2418_s26 = smov 1   ;;  %v259_v2 = vperm.slane %v2470_v0, 1  ;;  %v2537_v12 = vld [vmem:[%s3853_s1 + $0x2] ss:$8 sm:$0x3] }
   0xd   : > { %s4096_s22 = smov (!%p242_p3, %s2126_s22), 1  ;;  %v298_v13 = vperm.slane %v2537_v12, 0  ;;  %s2419_s9 = smov 16   ;;  %v299_v14 = vperm.slane %v2537_v12, 1  ;;  %v2545_v19 = vand.u32 127, %v266_v16  ;;  %v2421_v37 = vmov 0.0  }
   0xe   : > { %281 = vrot.lane.b32.xlu1 %v258_v1, %s2417_s25  ;;  %262 = vrot.lane.b32.xlu0 %v258_v1, %s2418_s26  ;;  %s2235_s27 = sshll.u32 %s4096_s22, 6  ;;  %s2420_s10 = smov 112   ;;  %vm774_vm14 = vcmask 261120  }
   0xf   : > { %s2483_s30 = scalar_lea.vmem %s3852_s0, %s2235_s27  ;;  %vm285_vm0 = vcmp.lt.s32.totalorder %v2545_v19, 127  ;;  %vm268_vm1 = vcmp.lt.s32.totalorder %v2545_v19, 1  ;;  %vm306_vm5 = vcmp.lt.s32.totalorder %v2545_v19, 16  ;;  %vm322_vm6 = vcmp.lt.s32.totalorder %v2545_v19, 112  ;;  %s3831_s15 = scalar_lea.vmem %s3858_s6, %s2235_s27 }
  0x10   : > { %v2486_v3 = vld [vmem:[%s2483_s30] sm:$0xff]  ;;  %v2491_v4 = vld [vmem:[%s2483_s30 + $0x10] sm:$0xff]  ;;  %v2494_v5 = vld [vmem:[%s2483_s30 + $0x18] sm:$0xff] }
  0x11   : > { %382 = vrot.lane.b32.xlu2 %v2486_v3, %s2418_s26  ;;  %v2497_v6 = vld [vmem:[%s2483_s30 + $0x8] sm:$0xff]  ;;  %v2503_v7 = vld [vmem:[%s2483_s30 + $0x20] sm:$0xff]  ;;  %v2519_v9 = vld [vmem:[%s2483_s30 + $0x38] sm:$0xff] }
  0x12   : > { %v2506_v8 = vld [vmem:[%s2483_s30 + $0x28] sm:$0xff]  ;;  %v2522_v10 = vld [vmem:[%s2483_s30 + $0x30] sm:$0xff] }
  0x16   : > { %283 = vrot.lane.b32.xlu1 %v259_v2, %s2417_s25  ;;  %264 = vrot.lane.b32.xlu0 %v259_v2, %s2418_s26 }
  0x19   : > { %384 = vrot.lane.b32.xlu2 %v2491_v4, %s2418_s26 }
  0x1e   : > { %392 = vrot.lane.b32.xlu1 %v2494_v5, %s2418_s26  ;;  %390 = vrot.lane.b32.xlu0 %v2497_v6, %s2418_s26 }
  0x21   : > { %386 = vrot.lane.b32.xlu2 %v2503_v7, %s2418_s26 }
  0x26   : > { %394 = vrot.lane.b32.xlu0 %v2506_v8, %s2418_s26  ;;  %427 = vrot.lane.b32.xlu1 %v2486_v3, %s2417_s25 }
  0x29   : > { %429 = vrot.lane.b32.xlu2 %v2491_v4, %s2417_s25 }
  0x2e   : > { %435 = vrot.lane.b32.xlu0 %v2497_v6, %s2417_s25  ;;  %437 = vrot.lane.b32.xlu1 %v2494_v5, %s2417_s25 }
  0x31   : > { %388 = vrot.lane.b32.xlu2 %v2522_v10, %s2418_s26 }
  0x36   : > { %396 = vrot.lane.b32.xlu0 %v2519_v9, %s2418_s26  ;;  %431 = vrot.lane.b32.xlu1 %v2503_v7, %s2417_s25 }
  0x39   : > { %439 = vrot.lane.b32.xlu2 %v2506_v8, %s2417_s25 }
  0x3e   : > { %433 = vrot.lane.b32.xlu0 %v2522_v10, %s2417_s25  ;;  %441 = vrot.lane.b32.xlu1 %v2519_v9, %s2417_s25 }
  0x41   : > { %302 = vrot.lane.b32.xlu2 %v298_v13, %s2419_s9 }
  0x46   : > { %318 = vrot.lane.b32.xlu1 %v298_v13, %s2420_s10  ;;  %304 = vrot.lane.b32.xlu0 %v299_v14, %s2419_s9 }
  0x49   : > { %320 = vrot.lane.b32.xlu2 %v299_v14, %s2420_s10 }
  0x6b   : > { %v383_v11 = vpop.permute.xlu2 %382 }
  0x73   : > { %v385_v15 = vpop.permute.xlu2 %384 }
  0x7b   : > { %v387_v20 = vpop.permute.xlu2 %386 }
  0x80   : > { %v282_v17 = vpop.permute.xlu1 %281  ;;  %v263_v18 = vpop.permute.xlu0 %262 }
  0x83   : > { %v430_v36 = vpop.permute.xlu2 %429 }
  0x88   : > { %v284_v21 = vpop.permute.xlu1 %283  ;;  %v265_v22 = vpop.permute.xlu0 %264 }
  0x89   : > { %v287_v23 = vsel %vm285_vm0, %v284_v21, %v282_v17  ;;  %v269_v24 = vsel %vm268_vm1, %v263_v18, %v265_v22  ;;  %v270_v27 = vsel %vm268_vm1, %v265_v22, %v263_v18  ;;  %v286_v30 = vsel %vm285_vm0, %v282_v17, %v284_v21 }
  0x8a   : > { %v273_v25 = vrot.slane %v269_v24, 7  ;;  %v290_v26 = vrot.slane %v287_v23, 7 }
  0x8b   : > { %v389_v47 = vpop.permute.xlu2 %388 }
  0x8c   : > { %v275_v28 = vsel %vm274_vm2, %v270_v27, %v273_v25  ;;  %v291_v31 = vsel %vm274_vm2, %v286_v30, %v290_v26 }
  0x8d   : > { %v277_v29 = vsub.f32 %v2470_v0, %v275_v28  ;;  %v293_v35 = vsub.f32 %v2470_v0, %v291_v31 }
  0x8f   : > { %v278_v32 = vand.u32 2147483647, %v277_v29  ;;  %v294_v39 = vand.u32 2147483647, %v293_v35 }
  0x90   : > { %v393_v33 = vpop.permute.xlu1 %392  ;;  %v391_v34 = vpop.permute.xlu0 %390 }
  0x91   : > { %vm279_vm3 = vcmp.eq.f32.partialorder %v278_v32, 1.0  ;;  %vm295_vm4 = vcmp.eq.f32.partialorder %v294_v39, 1.0  ;;  %v403_v44 = vsel %vm268_vm1, %v393_v33, %v385_v15  ;;  %v402_v46 = vsel %vm268_vm1, %v391_v34, %v383_v11 }
  0x92   : > { %v280_v38 = vsel %vm279_vm3, 1.0, %v2421_v37  ;;  %v296_v48 = vsel %vm295_vm4, 1.0, %v2421_v37  ;;  %v398_v49 = vsel %vm268_vm1, %v383_v11, %v391_v34  ;;  %v399_v11 = vsel %vm268_vm1, %v385_v15, %v393_v33 }
  0x93   : > { %v2562_v40 = vperm.slane %v280_v38, 0  ;;  %v408_v43 = vperm.slane %v280_v38, 1  ;;  %v452_v52 = vperm.slane %v296_v48, 0  ;;  %v453_v53 = vperm.slane %v296_v48, 1  ;;  %v440_v15 = vpop.permute.xlu2 %439 }
  0x95   : > { %v413_v45 = vmul.f32 %v2562_v40, %v403_v44  ;;  %v411_v50 = vmul.f32 %v2562_v40, %v402_v46  ;;  %v412_v51 = vmul.f32 %v408_v43, %v398_v49  ;;  %v414_v17 = vmul.f32 %v408_v43, %v399_v11 }
  0x97   : > { %v421_v54 = vadd.f32 %v413_v45, %v2491_v4  ;;  %v419_v57 = vadd.f32 %v411_v50, %v2486_v3  ;;  %v420_v61 = vadd.f32 %v412_v51, %v2497_v6  ;;  %v422_v25 = vadd.f32 %v414_v17, %v2494_v5 }
  0x98   : > { %v395_v41 = vpop.permute.xlu0 %394  ;;  %v428_v42 = vpop.permute.xlu1 %427 }
  0x99   : > { %v400_v1 = vsel %vm268_vm1, %v387_v20, %v395_v41  ;;  %v404_v2 = vsel %vm268_vm1, %v395_v41, %v387_v20 }
  0x9a   : > { %v415_v21 = vmul.f32 %v2562_v40, %v404_v2  ;;  %v416_v22 = vmul.f32 %v408_v43, %v400_v1 }
  0x9c   : > { %v423_v28 = vadd.f32 %v415_v21, %v2503_v7  ;;  %v424_v29 = vadd.f32 %v416_v22, %v2506_v8  ;;  %v365_v22 = vld [vmem:[%s3855_s3 + $0x78] sm:$0xff] }
  0xa0   : > { %v436_v55 = vpop.permute.xlu0 %435  ;;  %v438_v56 = vpop.permute.xlu1 %437 }
  0xa1   : > { %v443_v58 = vsel %vm285_vm0, %v428_v42, %v436_v55  ;;  %v447_v59 = vsel %vm285_vm0, %v436_v55, %v428_v42  ;;  %v444_v60 = vsel %vm285_vm0, %v430_v36, %v438_v56  ;;  %v448_v18 = vsel %vm285_vm0, %v438_v56, %v430_v36 }
  0xa2   : > { %v456_v62 = vmul.f32 %v452_v52, %v443_v58  ;;  %v457_v63 = vmul.f32 %v453_v53, %v447_v59  ;;  %v458_v0 = vmul.f32 %v452_v52, %v444_v60  ;;  %v459_v20 = vmul.f32 %v453_v53, %v448_v18 }
  0xa4   : > { %v2588_v13 = vadd.f32 %v456_v62, %v419_v57  ;;  %v2590_v14 = vadd.f32 %v457_v63, %v420_v61  ;;  %v2592_v16 = vadd.f32 %v458_v0, %v421_v54  ;;  %v2610_v32 = vadd.f32 %v459_v20, %v422_v25 }
  0xa6   : > { %472 = vrot.lane.b32.xlu0 %v2588_v13, %s2419_s9  ;;  %480 = vrot.lane.b32.xlu2 %v2590_v14, %s2419_s9 }
  0xa7   : > { %474 = vrot.lane.b32.xlu1 %v2592_v16, %s2419_s9 }
  0xa8   : > { %v397_v23 = vpop.permute.xlu0 %396  ;;  %v432_v24 = vpop.permute.xlu1 %431 }
  0xa9   : > { %v445_v26 = vsel %vm285_vm0, %v432_v24, %v440_v15  ;;  %v449_v27 = vsel %vm285_vm0, %v440_v15, %v432_v24  ;;  %v401_v38 = vsel %vm268_vm1, %v389_v47, %v397_v23  ;;  %v405_v39 = vsel %vm268_vm1, %v397_v23, %v389_v47 }
  0xaa   : > { %v460_v30 = vmul.f32 %v452_v52, %v445_v26  ;;  %v461_v31 = vmul.f32 %v453_v53, %v449_v27  ;;  %v418_v42 = vmul.f32 %v408_v43, %v401_v38  ;;  %v417_v45 = vmul.f32 %v2562_v40, %v405_v39  ;;  %v303_v40 = vpop.permute.xlu2 %302 }
  0xab   : > { %v2422_v15 = vmov 0  }
  0xac   : > { %v2612_v33 = vadd.f32 %v461_v31, %v424_v29  ;;  %v2614_v34 = vadd.f32 %v460_v30, %v423_v28  ;;  %v426_v48 = vadd.f32 %v418_v42, %v2519_v9  ;;  %v425_v43 = vadd.f32 %v417_v45, %v2522_v10  ;;  %2260 = vset.pattern.permute.xlu1 %v2422_v15 }
  0xad   : > { %2261 = vset.pattern.permute.xlu2 %v2422_v15  ;;  %2262 = vset.pattern.permute.xlu0 %v2422_v15 }
  0xae   : > { %482 = vrot.lane.b32.xlu0 %v2610_v32, %s2419_s9  ;;  %484 = vrot.lane.b32.xlu2 %v2612_v33, %s2419_s9 }
  0xaf   : > { %476 = vrot.lane.b32.xlu1 %v2614_v34, %s2419_s9 }
  0xb0   : > { %v434_v35 = vpop.permute.xlu0 %433  ;;  %v442_v36 = vpop.permute.xlu1 %441 }
  0xb1   : > { %v450_v41 = vsel %vm285_vm0, %v442_v36, %v434_v35  ;;  %v446_v44 = vsel %vm285_vm0, %v434_v35, %v442_v36 }
  0xb2   : > { %v463_v46 = vmul.f32 %v453_v53, %v450_v41  ;;  %v462_v47 = vmul.f32 %v452_v52, %v446_v44  ;;  %v321_v51 = vpop.permute.xlu2 %320 }
  0xb4   : > { %v2639_v49 = vadd.f32 %v463_v46, %v426_v48  ;;  %v2641_v50 = vadd.f32 %v462_v47, %v425_v43  ;;  %v252_v48 = vld [vmem:[%s3853_s1] ss:$8 sm:$0x3] }
  0xb6   : > { %517 = vrot.lane.b32.xlu0 %v2588_v13, %s2420_s10  ;;  %525 = vrot.lane.b32.xlu2 %v2590_v14, %s2420_s10 }
  0xb7   : > { %519 = vrot.lane.b32.xlu1 %v2592_v16, %s2420_s10 }
  0xb8   : > { %v319_v52 = vpop.permute.xlu1 %318  ;;  %v305_v53 = vpop.permute.xlu0 %304 }
  0xb9   : > { %v307_v54 = vsel %vm306_vm5, %v303_v40, %v305_v53  ;;  %v308_v59 = vsel %vm306_vm5, %v305_v53, %v303_v40  ;;  %v324_v60 = vsel %vm322_vm6, %v321_v51, %v319_v52  ;;  %v323_v63 = vsel %vm322_vm6, %v319_v52, %v321_v51 }
  0xba   : > { %v311_v57 = vrot.slane %v307_v54, 7  ;;  %v327_v62 = vrot.slane %v324_v60, 7 }
  0xbc   : > { %v312_v61 = vsel %vm274_vm2, %v308_v59, %v311_v57  ;;  %v328_v2 = vsel %vm274_vm2, %v323_v63, %v327_v62  ;;  %v563_v57 = vperm.slane %v252_v48, 0 }
  0xbd   : > { %v314_v0 = vsub.f32 %v2537_v12, %v312_v61  ;;  %v330_v21 = vsub.f32 %v2537_v12, %v328_v2  ;;  %v362_v12 = vld [vmem:[%s3855_s3 + $0x60] sm:$0xff]  ;;  %v564_v61 = vperm.slane %v252_v48, 1 }
  0xbe   : > { %527 = vrot.lane.b32.xlu0 %v2610_v32, %s2420_s10  ;;  %486 = vrot.lane.b32.xlu2 %v2639_v49, %s2419_s9 }
  0xbf   : > { %478 = vrot.lane.b32.xlu1 %v2641_v50, %s2419_s9  ;;  %v315_v18 = vand.u32 2147483647, %v314_v0  ;;  %v331_v20 = vand.u32 2147483647, %v330_v21 }
  0xc1   : > { %vm316_vm7 = vcmp.eq.f32.partialorder %v315_v18, 1.0  ;;  %vm332_vm8 = vcmp.eq.f32.partialorder %v331_v20, 1.0 }
  0xc2   : > { %v317_v25 = vsel %vm316_vm7, 1.0, %v2421_v37  ;;  %v333_v29 = vsel %vm332_vm8, 1.0, %v2421_v37 }
  0xc3   : > { %v497_v27 = vperm.slane %v317_v25, 0  ;;  %v498_v28 = vperm.slane %v317_v25, 1  ;;  %v542_v42 = vperm.slane %v333_v29, 0  ;;  %v543_v37 = vperm.slane %v333_v29, 1 }
  0xc6   : > { %523 = vrot.lane.b32.xlu2 %v2641_v50, %s2420_s10  ;;  %521 = vrot.lane.b32.xlu0 %v2614_v34, %s2420_s10 }
  0xc7   : > { %529 = vrot.lane.b32.xlu1 %v2612_v33, %s2420_s10 }
  0xce   : > { %531 = vrot.lane.b32.xlu0 %v2639_v49, %s2420_s10 }
  0xcf   : > { %771 = vperm.xlu1 %2260, %v365_v22  }
  0xd7   : > { %756 = vperm.xlu1 %2260, %v362_v12  }
 0x100   : > { %v481_v55 = vpop.permute.xlu2 %480 }
 0x108   : > { %v485_v17 = vpop.permute.xlu2 %484 }
 0x110   : > { %v526_v26 = vpop.permute.xlu2 %525 }
 0x118   : > { %v473_v56 = vpop.permute.xlu0 %472 }
 0x119   : > { %v475_v58 = vpop.permute.xlu1 %474  ;;  %v492_v30 = vsel %vm306_vm5, %v481_v55, %v473_v56  ;;  %v488_v31 = vsel %vm306_vm5, %v473_v56, %v481_v55  ;;  %v487_v56 = vpop.permute.xlu2 %486 }
 0x11a   : > { %v501_v44 = vmul.f32 %v497_v27, %v492_v30  ;;  %v502_v46 = vmul.f32 %v498_v28, %v488_v31 }
 0x11c   : > { %v509_v60 = vadd.f32 %v501_v44, %v2588_v13  ;;  %v510_v0 = vadd.f32 %v502_v46, %v2590_v14 }
 0x120   : > { %v483_v1 = vpop.permute.xlu0 %482 }
 0x121   : > { %v477_v11 = vpop.permute.xlu1 %476  ;;  %v493_v35 = vsel %vm306_vm5, %v483_v1, %v475_v58  ;;  %v489_v38 = vsel %vm306_vm5, %v475_v58, %v483_v1 }
 0x122   : > { %v494_v39 = vsel %vm306_vm5, %v485_v17, %v477_v11  ;;  %v490_v45 = vsel %vm306_vm5, %v477_v11, %v485_v17  ;;  %v503_v47 = vmul.f32 %v497_v27, %v493_v35  ;;  %v504_v51 = vmul.f32 %v498_v28, %v489_v38  ;;  %v524_v38 = vpop.permute.xlu2 %523 }
 0x123   : > { %v505_v52 = vmul.f32 %v497_v27, %v494_v39  ;;  %v506_v55 = vmul.f32 %v498_v28, %v490_v45 }
 0x124   : > { %v511_v1 = vadd.f32 %v503_v47, %v2592_v16  ;;  %v512_v2 = vadd.f32 %v504_v51, %v2610_v32 }
 0x125   : > { %v513_v11 = vadd.f32 %v505_v52, %v2614_v34  ;;  %v514_v18 = vadd.f32 %v506_v55, %v2612_v33  ;;  %v2423_v33 = vmov 32.0  }
 0x126   : > { %2263 = vrcp.f32 %v2423_v33 }
 0x128   : > { %v518_v23 = vpop.permute.xlu0 %517 }
 0x129   : > { %v520_v24 = vpop.permute.xlu1 %519  ;;  %v533_v53 = vsel %vm322_vm6, %v518_v23, %v526_v26  ;;  %v537_v54 = vsel %vm322_vm6, %v526_v26, %v518_v23 }
 0x12a   : > { %v546_v62 = vmul.f32 %v542_v42, %v533_v53  ;;  %v547_v63 = vmul.f32 %v543_v37, %v537_v54 }
 0x12c   : > { %v554_v32 = vadd.f32 %v546_v62, %v509_v60  ;;  %v555_v34 = vadd.f32 %v547_v63, %v510_v0 }
 0x12e   : > { %v567_v35 = vmul.f32 %v563_v57, %v554_v32 }
 0x130   : > { %v528_v36 = vpop.permute.xlu0 %527  ;;  %v575_v52 = vsub.f32 %v567_v35, %v2486_v3 }
 0x131   : > { %v479_v41 = vpop.permute.xlu1 %478  ;;  %v534_v43 = vsel %vm322_vm6, %v520_v24, %v528_v36  ;;  %v538_v40 = vsel %vm322_vm6, %v528_v36, %v520_v24  ;;  %v568_v36 = vmul.f32 %v564_v61, %v555_v34 }
 0x132   : > { %v548_v58 = vmul.f32 %v542_v42, %v534_v43  ;;  %v549_v59 = vmul.f32 %v543_v37, %v538_v40  ;;  %v491_v21 = vsel %vm306_vm5, %v479_v41, %v487_v56  ;;  %v495_v13 = vsel %vm306_vm5, %v487_v56, %v479_v41 }
 0x133   : > { %v507_v25 = vmul.f32 %v497_v27, %v495_v13  ;;  %v508_v26 = vmul.f32 %v498_v28, %v491_v21  ;;  %v2264_v28 = vpop.eup %2263  ;;  %v576_v53 = vsub.f32 %v568_v36, %v2497_v6 }
 0x134   : > { %v556_v15 = vadd.f32 %v548_v58, %v511_v1  ;;  %v557_v20 = vadd.f32 %v549_v59, %v512_v2  ;;  %v602_v56 = vmul.f32 32.0, %v2264_v28  ;;  %vm606_vm9 = vweird.f32 %v2264_v28 }
 0x135   : > { %v515_v45 = vadd.f32 %v507_v25, %v2641_v50  ;;  %v516_v46 = vadd.f32 %v508_v26, %v2639_v49 }
 0x136   : > { %v569_v30 = vmul.f32 %v563_v57, %v556_v15  ;;  %v570_v31 = vmul.f32 %v564_v61, %v557_v20  ;;  %v603_v3 = vsub.f32 1.0, %v602_v56 }
 0x138   : > { %v522_v17 = vpop.permute.xlu0 %521  ;;  %v577_v48 = vsub.f32 %v569_v30, %v2491_v4  ;;  %v578_v43 = vsub.f32 %v570_v31, %v2494_v5  ;;  %v604_v0 = vmul.f32 %v2264_v28, %v603_v3 }
 0x139   : > { %v530_v22 = vpop.permute.xlu1 %529 }
 0x13a   : > { %v535_v14 = vsel %vm322_vm6, %v522_v17, %v530_v22  ;;  %v539_v16 = vsel %vm322_vm6, %v530_v22, %v522_v17  ;;  %v583_v19 = vadd.f32 %v577_v48, %v575_v52  ;;  %v592_v58 = vadd.f32 %v578_v43, %v576_v53 }
 0x13b   : > { %v550_v23 = vmul.f32 %v542_v42, %v535_v14  ;;  %v551_v24 = vmul.f32 %v543_v37, %v539_v16  ;;  %v605_v17 = vadd.f32 %v2264_v28, %v604_v0 }
 0x13d   : > { %v558_v12 = vadd.f32 %v550_v23, %v513_v11  ;;  %v559_v29 = vadd.f32 %v551_v24, %v514_v18  ;;  %v607_v21 = vsel %vm606_vm9, %v2264_v28, %v605_v17 }
 0x13f   : > { %v571_v39 = vmul.f32 %v563_v57, %v558_v12  ;;  %v572_v41 = vmul.f32 %v564_v61, %v559_v29 }
 0x140   : > { %v532_v44 = vpop.permute.xlu0 %531 }
 0x141   : > { %v536_v47 = vsel %vm322_vm6, %v524_v38, %v532_v44  ;;  %v540_v27 = vsel %vm322_vm6, %v532_v44, %v524_v38  ;;  %v579_v50 = vsub.f32 %v571_v39, %v2503_v7  ;;  %v580_v49 = vsub.f32 %v572_v41, %v2506_v8 }
 0x142   : > { %v552_v40 = vmul.f32 %v542_v42, %v536_v47  ;;  %v553_v51 = vmul.f32 %v543_v37, %v540_v27 }
 0x143   : > { %v584_v5 = vadd.f32 %v583_v19, %v579_v50  ;;  %v593_v37 = vadd.f32 %v592_v58, %v580_v49 }
 0x144   : > { %v560_v54 = vadd.f32 %v552_v40, %v515_v45  ;;  %v561_v55 = vadd.f32 %v553_v51, %v516_v46 }
 0x146   : > { %v573_v59 = vmul.f32 %v563_v57, %v560_v54  ;;  %v574_v60 = vmul.f32 %v564_v61, %v561_v55 }
 0x148   : > { %v581_v4 = vsub.f32 %v573_v59, %v2522_v10  ;;  %v582_v42 = vsub.f32 %v574_v60, %v2519_v9 }
 0x14a   : > { %v585_v62 = vadd.f32 %v584_v5, %v581_v4  ;;  %v594_v6 = vadd.f32 %v593_v37, %v582_v42 }
 0x14c   : > { %v586_v63 = vrot.slane %v585_v62, 4  ;;  %v595_v7 = vrot.slane %v594_v6, 4 }
 0x14e   : > { %v587_v8 = vadd.f32 %v586_v63, %v585_v62  ;;  %v596_v1 = vadd.f32 %v595_v7, %v594_v6  ;;  %v364_v62 = vld [vmem:[%s3855_s3 + $0x70] sm:$0xff] }
 0x14f   : > { %v360_v6 = vld [vmem:[%s3855_s3 + $0x50] sm:$0xff]  ;;  %766 = vperm.xlu2 %2261, %v364_v62  }
 0x150   : > { %v588_v2 = vrot.slane %v587_v8, 2  ;;  %v597_v11 = vrot.slane %v596_v1, 2  ;;  %746 = vperm.xlu1 %2260, %v360_v6   ;;  %v340_v62 = vld [vmem:[%s3854_s2 + $0x30] sm:$0xff] }
 0x151   : > { %v372_v6 = vld [vmem:[%s3857_s5 + $0x10] sm:$0xff] }
 0x152   : > { %v589_v18 = vadd.f32 %v588_v2, %v587_v8  ;;  %v598_v57 = vadd.f32 %v597_v11, %v596_v1 }
 0x154   : > { %v590_v61 = vrot.slane %v589_v18, 1  ;;  %v599_v10 = vrot.slane %v598_v57, 1 }
 0x156   : > { %v591_v13 = vadd.f32 %v590_v61, %v589_v18  ;;  %v600_v9 = vadd.f32 %v599_v10, %v598_v57  ;;  %v361_v61 = vld [vmem:[%s3855_s3 + $0x58] sm:$0xff]  ;;  %v363_v10 = vld [vmem:[%s3855_s3 + $0x68] sm:$0xff] }
 0x157   : > { %751 = vperm.xlu2 %2261, %v361_v61   ;;  %761 = vperm.xlu0 %2262, %v363_v10  }
 0x158   : > { %v608_v22 = vmul.f32 %v607_v21, %v591_v13  ;;  %v609_v15 = vmul.f32 %v607_v21, %v600_v9 }
 0x15a   : > { %v2730_v20 = vsub.f32 %v575_v52, %v608_v22  ;;  %v2732_v14 = vsub.f32 %v577_v48, %v608_v22  ;;  %v2734_v16 = vsub.f32 %v579_v50, %v608_v22  ;;  %v2736_v32 = vsub.f32 %v576_v53, %v609_v15 }
 0x15b   : > { %v2738_v34 = vsub.f32 %v578_v43, %v609_v15  ;;  %v2740_v23 = vsub.f32 %v580_v49, %v609_v15  ;;  %v2742_v24 = vsub.f32 %v581_v4, %v608_v22  ;;  %v2748_v26 = vsub.f32 %v582_v42, %v609_v15 }
 0x15c   : > { %v618_v33 = vmul.f32 %v2730_v20, %v2730_v20  ;;  %v620_v25 = vmul.f32 %v2732_v14, %v2732_v14  ;;  %v619_v12 = vmul.f32 %v2736_v32, %v2736_v32  ;;  %v622_v30 = vmul.f32 %v2734_v16, %v2734_v16 }
 0x15d   : > { %v621_v29 = vmul.f32 %v2738_v34, %v2738_v34  ;;  %v623_v35 = vmul.f32 %v2740_v23, %v2740_v23  ;;  %v624_v38 = vmul.f32 %v2742_v24, %v2742_v24  ;;  %v625_v41 = vmul.f32 %v2748_v26, %v2748_v26 }
 0x15e   : > { %v626_v31 = vadd.f32 %v620_v25, %v618_v33  ;;  %v359_v33 = vld [vmem:[%s3855_s3 + $0x48] sm:$0xff]  ;;  %v358_v25 = vld [vmem:[%s3855_s3 + $0x40] sm:$0xff] }
 0x15f   : > { %v635_v36 = vadd.f32 %v621_v29, %v619_v12  ;;  %v354_v12 = vld [vmem:[%s3855_s3 + $0x20] sm:$0xff]  ;;  %741 = vperm.xlu2 %2261, %v359_v33   ;;  %736 = vperm.xlu0 %2262, %v358_v25  }
 0x160   : > { %v627_v39 = vadd.f32 %v626_v31, %v622_v30 }
 0x161   : > { %v636_v44 = vadd.f32 %v635_v36, %v623_v35 }
 0x162   : > { %v628_v45 = vadd.f32 %v627_v39, %v624_v38 }
 0x163   : > { %v637_v46 = vadd.f32 %v636_v44, %v625_v41 }
 0x164   : > { %v629_v47 = vrot.slane %v628_v45, 4 }
 0x165   : > { %v638_v27 = vrot.slane %v637_v46, 4 }
 0x166   : > { %v630_v28 = vadd.f32 %v629_v47, %v628_v45  ;;  %v356_v45 = vld [vmem:[%s3855_s3 + $0x30] sm:$0xff]  ;;  %v351_v47 = vld [vmem:[%s3855_s3 + $0x8] sm:$0xff] }
 0x167   : > { %v639_v48 = vadd.f32 %v638_v27, %v637_v46  ;;  %v355_v46 = vld [vmem:[%s3855_s3 + $0x28] sm:$0xff]  ;;  %726 = vperm.xlu2 %2261, %v356_v45  }
 0x168   : > { %v631_v43 = vrot.slane %v630_v28, 2  ;;  %721 = vperm.xlu0 %2262, %v355_v46  }
 0x169   : > { %v640_v40 = vrot.slane %v639_v48, 2 }
 0x16a   : > { %v632_v51 = vadd.f32 %v631_v43, %v630_v28 }
 0x16b   : > { %v641_v52 = vadd.f32 %v640_v40, %v639_v48 }
 0x16c   : > { %v633_v53 = vrot.slane %v632_v51, 1 }
 0x16d   : > { %v642_v50 = vrot.slane %v641_v52, 1 }
 0x16e   : > { %v634_v49 = vadd.f32 %v633_v53, %v632_v51 }
 0x16f   : > { %v643_v54 = vadd.f32 %v642_v50, %v641_v52 }
 0x170   : > { %v644_v55 = vmul.f32 %v634_v49, %v607_v21 }
 0x171   : > { %v645_v56 = vmul.f32 %v643_v54, %v607_v21  ;;  %v357_v21 = vld [vmem:[%s3855_s3 + $0x38] sm:$0xff]  ;;  %v346_v54 = vld [vmem:[%s3854_s2 + $0x60] sm:$0xff] }
 0x172   : > { %v646_v19 = vadd.f32 1e-06, %v644_v55  ;;  %731 = vperm.xlu1 %2260, %v357_v21   ;;  %v350_v55 = vld [vmem:[%s3855_s3] sm:$0xff] }
 0x173   : > { %v647_v58 = vadd.f32 1e-06, %v645_v56  ;;  %v336_v56 = vld [vmem:[%s3854_s2 + $0x10] sm:$0xff] }
 0x174   : > { %2265 = vrsqrt.f32 %v646_v19  ;;  %vm655_vm10 = vcmp.eq.f32.partialorder %v646_v19, inf  ;;  %v658_v11 = vand.u32 2147483648, %v646_v19  ;;  %vm657_vm11 = vcmp.eq.f32.partialorder %v646_v19, 0.0 }
 0x175   : > { %2267 = vrsqrt.f32 %v647_v58  ;;  %vm667_vm12 = vcmp.eq.f32.partialorder %v647_v58, inf  ;;  %v670_v57 = vand.u32 2147483648, %v647_v58  ;;  %vm669_vm13 = vcmp.eq.f32.partialorder %v647_v58, 0.0 }
 0x17a   : > { %v2266_v59 = vpop.eup %2265  ;;  %716 = vperm.xlu1 %2260, %v354_v12  }
 0x17b   : > { %v2268_v60 = vpop.eup %2267  ;;  %v649_v4 = vmul.f32 %v2266_v59, %v646_v19 }
 0x17c   : > { %v661_v5 = vmul.f32 %v2268_v60, %v647_v58 }
 0x17d   : > { %v650_v42 = vmul.f32 %v2266_v59, %v649_v4  ;;  %v349_v4 = vld [vmem:[%s3854_s2 + $0x78] sm:$0xff] }
 0x17e   : > { %v662_v37 = vmul.f32 %v2268_v60, %v661_v5  ;;  %v370_v5 = vld [vmem:[%s3857_s5] sm:$0xff] }
 0x17f   : > { %v651_v3 = vmul.f32 0.5, %v650_v42  ;;  %v371_v42 = vld [vmem:[%s3857_s5 + $0x8] sm:$0xff] }
 0x180   : > { %v663_v63 = vmul.f32 0.5, %v662_v37  ;;  %v339_v37 = vld [vmem:[%s3854_s2 + $0x28] sm:$0xff] }
 0x181   : > { %v652_v7 = vsub.f32 1.5, %v651_v3  ;;  %v373_v3 = vld [vmem:[%s3857_s5 + $0x18] sm:$0xff] }
 0x182   : > { %v664_v0 = vsub.f32 1.5, %v663_v63  ;;  %701 = vperm.xlu1 %2260, %v351_v47   ;;  %v341_v63 = vld [vmem:[%s3854_s2 + $0x38] sm:$0xff] }
 0x183   : > { %v653_v8 = vmul.f32 %v2266_v59, %v652_v7  ;;  %v348_v59 = vld [vmem:[%s3854_s2 + $0x70] sm:$0xff]  ;;  %v342_v7 = vld [vmem:[%s3854_s2 + $0x40] sm:$0xff] }
 0x184   : > { %v665_v1 = vmul.f32 %v2268_v60, %v664_v0  ;;  %v338_v60 = vld [vmem:[%s3854_s2 + $0x20] sm:$0xff]  ;;  %v343_v0 = vld [vmem:[%s3854_s2 + $0x48] sm:$0xff] }
 0x185   : > { %v654_v2 = vmul.f32 %v653_v8, %v646_v19 }
 0x186   : > { %v666_v17 = vmul.f32 %v665_v1, %v647_v58 }
 0x187   : > { %v656_v18 = vsel %vm655_vm10, %v646_v19, %v654_v2  ;;  %v347_v19 = vld [vmem:[%s3854_s2 + $0x68] sm:$0xff]  ;;  %v2908_v2 = vpop.permute.xlu1 %771 }
 0x188   : > { %v659_v13 = vsel %vm657_vm11, %v658_v11, %v656_v18  ;;  %v668_v9 = vsel %vm667_vm12, %v647_v58, %v666_v17  ;;  %v337_v58 = vld [vmem:[%s3854_s2 + $0x18] sm:$0xff] }
 0x189   : > { %2269 = vrcp.f32 %v659_v13  ;;  %v671_v22 = vsel %vm669_vm13, %v670_v57, %v668_v9 }
 0x18a   : > { %2271 = vrcp.f32 %v671_v22  ;;  %1984 = vperm.xlu1 %2260, %v371_v42  }
 0x18f   : > { %v2270_v15 = vpop.eup %2269  ;;  %v2912_v17 = vpop.permute.xlu1 %756 }
 0x190   : > { %v2272_v29 = vpop.eup %2271  ;;  %v674_v30 = vmul.f32 %v2270_v15, %v659_v13 }
 0x191   : > { %v675_v31 = vmul.f32 %v2272_v29, %v671_v22 }
 0x192   : > { %v676_v35 = vsub.f32 2.0, %v674_v30 }
 0x193   : > { %v677_v36 = vsub.f32 2.0, %v675_v31 }
 0x194   : > { %v678_v38 = vmul.f32 %v2270_v15, %v676_v35 }
 0x195   : > { %v679_v39 = vmul.f32 %v2272_v29, %v677_v36 }
 0x196   : > { %v680_v41 = vmul.f32 %v678_v38, %v659_v13 }
 0x197   : > { %v681_v44 = vmul.f32 %v679_v39, %v671_v22 }
 0x198   : > { %v682_v27 = vsub.f32 2.0, %v680_v41 }
 0x199   : > { %v683_v28 = vsub.f32 2.0, %v681_v44 }
 0x19a   : > { %v684_v48 = vmul.f32 %v682_v27, %v678_v38 }
 0x19b   : > { %v685_v43 = vmul.f32 %v683_v28, %v679_v39 }
 0x19c   : > { %v692_v40 = vmul.f32 %v684_v48, %v2742_v24  ;;  %v690_v52 = vmul.f32 %v684_v48, %v2734_v16  ;;  %v688_v50 = vmul.f32 %v684_v48, %v2732_v14  ;;  %v686_v24 = vmul.f32 %v684_v48, %v2730_v20  ;;  %v345_v14 = vld [vmem:[%s3854_s2 + $0x58] sm:$0xff] }
 0x19d   : > { %v693_v51 = vmul.f32 %v685_v43, %v2748_v26  ;;  %v691_v53 = vmul.f32 %v685_v43, %v2740_v23  ;;  %v689_v49 = vmul.f32 %v685_v43, %v2738_v34  ;;  %v687_v16 = vmul.f32 %v685_v43, %v2736_v32  ;;  %v334_v23 = vld [vmem:[%s3854_s2] sm:$0xff]  ;;  %v344_v34 = vld [vmem:[%s3854_s2 + $0x50] sm:$0xff]  ;;  %v353_v20 = vld [vmem:[%s3855_s3 + $0x18] sm:$0xff] }
 0x19e   : > { %835 = vmatpush.msra.mxu0 %v692_v40  ;;  %2237 = vmatpush.msra.mxu2 %v692_v40  ;;  %v352_v32 = vld [vmem:[%s3855_s3 + $0x10] sm:$0xff]  ;;  %v335_v26 = vld [vmem:[%s3854_s2 + $0x8] sm:$0xff] }
 0x19f   : > { %900 = vmatpush.msra.mxu1 %v693_v51  ;;  %2241 = vmatpush.msra.mxu3 %v693_v51 }
 0x1a0   : > { %836 = vmatpush.msra.mxu0 %v690_v52  ;;  %2238 = vmatpush.msra.mxu2 %v690_v52 }
 0x1a1   : > { %901 = vmatpush.msra.mxu1 %v691_v53  ;;  %2242 = vmatpush.msra.mxu3 %v691_v53 }
 0x1a2   : > { %837 = vmatpush.msra.mxu0 %v688_v50  ;;  %2239 = vmatpush.msra.mxu2 %v688_v50 }
 0x1a3   : > { %902 = vmatpush.msra.mxu1 %v689_v49  ;;  %2243 = vmatpush.msra.mxu3 %v689_v49 }
 0x1a4   : > { %838 = vmatpush.msra.mxu0 %v686_v24  ;;  %2240 = vmatpush.msra.mxu2 %v686_v24 }
 0x1a5   : > { %903 = vmatpush.msra.mxu1 %v687_v16  ;;  %2244 = vmatpush.msra.mxu3 %v687_v16 }
 0x1a6   : > { %2137 = vmatmul.msk.f32.vlgmr.msra.gmra.mxu0 %vm774_vm14, %v334_v23  ;;  %2148 = vmatmul.msk.f32.vlgmr.msra.gmra.mxu2 %vm774_vm14, %v345_v14 }
 0x1a7   : > { %2153 = vmatmul.msk.f32.vlgmr.msra.gmra.mxu1 %vm774_vm14, %v334_v23  ;;  %2163 = vmatmul.msk.f32.vlgmr.msra.gmra.mxu3 %vm774_vm14, %v344_v34 }
 0x1a8   : > { %711 = vperm.xlu2 %2261, %v353_v20   ;;  %706 = vperm.xlu0 %2262, %v352_v32  }
 0x1a9   : > { %v2903_v8 = vpop.permute.xlu2 %766 }
 0x1ae   : > { %2138 = vmatmul.msk.f32.gmra.mxu0 %vm774_vm14, %v335_v26  ;;  %2149 = vmatmul.msk.f32.gmra.mxu2 %vm774_vm14, %v346_v54 }
 0x1af   : > { %2154 = vmatmul.msk.f32.gmra.mxu1 %vm774_vm14, %v335_v26  ;;  %2164 = vmatmul.msk.f32.gmra.mxu3 %vm774_vm14, %v345_v14 }
 0x1b0   : > { %696 = vperm.xlu2 %2261, %v350_v55   ;;  %1979 = vperm.xlu0 %2262, %v370_v5  }
 0x1b1   : > { %v2906_v1 = vpop.permute.xlu2 %751 }
 0x1b6   : > { %2139 = vmatmul.msk.f32.gmra.mxu0 %vm774_vm14, %v336_v56  ;;  %2150 = vmatmul.msk.f32.gmra.mxu2 %vm774_vm14, %v347_v19 }
 0x1b7   : > { %2155 = vmatmul.msk.f32.gmra.mxu1 %vm774_vm14, %v336_v56  ;;  %2165 = vmatmul.msk.f32.gmra.mxu3 %vm774_vm14, %v346_v54 }
 0x1b8   : > { %1994 = vperm.xlu0 %2262, %v373_v3   ;;  %1989 = vperm.xlu2 %2261, %v372_v6  }
 0x1b9   : > { %v2910_v11 = vpop.permute.xlu2 %741 }
 0x1be   : > { %2140 = vmatmul.msk.f32.gmra.mxu0 %vm774_vm14, %v337_v58  ;;  %2151 = vmatmul.msk.f32.gmra.mxu2 %vm774_vm14, %v348_v59 }
 0x1bf   : > { %2156 = vmatmul.msk.f32.gmra.mxu1 %vm774_vm14, %v337_v58  ;;  %2166 = vmatmul.msk.f32.gmra.mxu3 %vm774_vm14, %v347_v19 }
 0x1c1   : > { %v2914_v18 = vpop.permute.xlu2 %726 }
 0x1c2   : > { %v2916_v57 = vpop.permute.xlu1 %746 }
 0x1c6   : > { %2141 = vmatmul.msk.f32.gmra.mxu0 %vm774_vm14, %v338_v60  ;;  %2152 = vmatmul.msk.f32.gmra.mxu2 %vm774_vm14, %v349_v4 }
 0x1c7   : > { %2157 = vmatmul.msk.f32.gmra.mxu1 %vm774_vm14, %v338_v60  ;;  %2167 = vmatmul.msk.f32.gmra.mxu3 %vm774_vm14, %v348_v59 }
 0x1c9   : > { %v2926_v33 = vpop.permute.xlu0 %761 }
 0x1ce   : > { %2142 = vmatmul.msk.f32.gmra.mxu0 %vm774_vm14, %v339_v37 }
 0x1cf   : > { %2158 = vmatmul.msk.f32.gmra.mxu1 %vm774_vm14, %v339_v37  ;;  %2168 = vmatmul.msk.f32.gmra.mxu3 %vm774_vm14, %v349_v4 }
 0x1d1   : > { %v2953_v40 = vpop.permute.xlu0 %736 }
 0x1d6   : > { %2143 = vmatmul.msk.f32.gmra.mxu0 %vm774_vm14, %v340_v62 }
 0x1d7   : > { %2159 = vmatmul.msk.f32.gmra.mxu1 %vm774_vm14, %v340_v62 }
 0x1da   : > { %v2980_v4 = vpop.permute.xlu0 %721 }
 0x1de   : > { %2144 = vmatmul.msk.f32.gmra.mxu0 %vm774_vm14, %v341_v63 }
 0x1df   : > { %2160 = vmatmul.msk.f32.gmra.mxu1 %vm774_vm14, %v341_v63 }
 0x1e4   : > { %v2920_v10 = vpop.permute.xlu1 %731 }
 0x1e6   : > { %2145 = vmatmul.msk.f32.gmra.mxu0 %vm774_vm14, %v342_v7 }
 0x1e7   : > { %2161 = vmatmul.msk.f32.gmra.mxu1 %vm774_vm14, %v342_v7 }
 0x1ec   : > { %v2922_v13 = vpop.permute.xlu1 %716 }
 0x1ee   : > { %2146 = vmatmul.msk.f32.gmra.mxu0 %vm774_vm14, %v343_v0 }
 0x1ef   : > { %2162 = vmatmul.msk.f32.gmra.mxu1 %vm774_vm14, %v343_v0 }
 0x1f4   : > { %v702_v27 = vpop.permute.xlu1 %701 }
 0x1f6   : > { %2147 = vmatmul.msk.f32.gmra.mxu0 %vm774_vm14, %v344_v34 }
 0x202   : > { %v2918_v61 = vpop.permute.xlu2 %711 }
 0x20a   : > { %v697_v21 = vpop.permute.xlu2 %696 }
 0x223   : > { %v840_v9 = vpop.f32.mrf.mxu0 }
 0x224   : > { %v905_v22 = vpop.f32.mrf.mxu1  ;;  %v2924_v15 = vadd.f32 %v840_v9, %v697_v21 }
 0x225   : > { %v2928_v25 = vadd.f32 %v905_v22, %v697_v21 }
 0x226   : > { %3921 = vst [vmem:[#allocation2_spill] sm:$0xff] %v2924_v15  ;;  %v2931_v12 = vmul.f32 0.70710677, %v2924_v15 }
 0x227   : > { %3922 = vst [vmem:[#allocation3_spill] sm:$0xff] %v2928_v25  ;;  %v2934_v29 = vmul.f32 0.70710677, %v2928_v25 }
 0x228   : > { %3923 = vst [vmem:[#allocation4_spill] sm:$0xff] %v2931_v12  ;;  %v985_v30 = vand.u32 2147483647, %v2931_v12 }
 0x229   : > { %3924 = vst [vmem:[#allocation5_spill] sm:$0xff] %v2934_v29  ;;  %v986_v31 = vand.u32 2147483647, %v2934_v29  ;;  %v873_v35 = vpop.f32.mrf.mxu2 }
 0x22a   : > { %v1017_v36 = vmul.f32 0.3275911, %v985_v30  ;;  %v2939_v38 = vadd.f32 %v873_v35, %v2906_v1  ;;  %v935_v39 = vpop.f32.mrf.mxu3  ;;  %v1593_v0 = vsub.f32 0.0, %v985_v30 }
 0x22b   : > { %v2942_v41 = vadd.f32 %v935_v39, %v2916_v57  ;;  %v1018_v44 = vmul.f32 0.3275911, %v986_v31  ;;  %v843_v28 = vpop.f32.mrf.mxu0  ;;  %v1594_v56 = vsub.f32 0.0, %v986_v31 }
 0x22c   : > { %v2945_v45 = vmul.f32 0.70710677, %v2939_v38  ;;  %v2947_v46 = vadd.f32 1.0, %v1017_v36  ;;  %v908_v43 = vpop.f32.mrf.mxu1  ;;  %v2958_v50 = vadd.f32 %v843_v28, %v702_v27  ;;  %v3002_v28 = vmul.f32 %v1593_v0, %v985_v30  ;;  %v707_v0 = vpop.permute.xlu0 %706 }
 0x22d   : > { %v2950_v47 = vmul.f32 0.70710677, %v2942_v41  ;;  %v2956_v52 = vadd.f32 1.0, %v1018_v44  ;;  %v2961_v24 = vadd.f32 %v908_v43, %v702_v27  ;;  %v1626_v6 = vmul.f32 %v1594_v56, %v986_v31 }
 0x22e   : > { %v1007_v48 = vand.u32 2147483647, %v2945_v45  ;;  %3926 = vst [vmem:[#allocation7_spill] sm:$0xff] %v2958_v50  ;;  %2273 = vrcp.f32 %v2947_v46  ;;  %v2966_v23 = vmul.f32 0.70710677, %v2958_v50  ;;  %vm1807_vm3 = vcmp.ge.f32.partialorder %v2945_v45, 0.0 }
 0x22f   : > { %3925 = vst [vmem:[#allocation6_spill] sm:$0xff] %v2950_v47  ;;  %v1006_v51 = vand.u32 2147483647, %v2950_v47  ;;  %v2969_v14 = vmul.f32 0.70710677, %v2961_v24  ;;  %2275 = vrcp.f32 %v2956_v52 }
 0x230   : > { %v1039_v53 = vmul.f32 0.3275911, %v1007_v48  ;;  %3927 = vst [vmem:[#allocation8_spill] sm:$0xff] %v2966_v23  ;;  %v987_v34 = vand.u32 2147483647, %v2966_v23  ;;  %v1615_v58 = vsub.f32 0.0, %v1007_v48 }
 0x231   : > { %v1038_v49 = vmul.f32 0.3275911, %v1006_v51  ;;  %3928 = vst [vmem:[#allocation9_spill] sm:$0xff] %v2969_v14  ;;  %v988_v32 = vand.u32 2147483647, %v2969_v14  ;;  %v876_v54 = vpop.f32.mrf.mxu2  ;;  %v1614_v3 = vsub.f32 0.0, %v1006_v51 }
 0x232   : > { %v2963_v16 = vadd.f32 1.0, %v1039_v53  ;;  %v1019_v26 = vmul.f32 0.3275911, %v987_v34  ;;  %v938_v60 = vpop.f32.mrf.mxu3  ;;  %v2983_v5 = vadd.f32 %v876_v54, %v2912_v17  ;;  %v1647_v21 = vmul.f32 %v1615_v58, %v1007_v48  ;;  %3930 = vst [vmem:[#allocation11_spill] sm:$0xff] %v3002_v28 }
 0x233   : > { %v2973_v20 = vadd.f32 1.0, %v1038_v49  ;;  %v1020_v19 = vmul.f32 0.3275911, %v988_v32  ;;  %v2990_v63 = vadd.f32 %v938_v60, %v2906_v1  ;;  %v1646_v36 = vmul.f32 %v1614_v3, %v1006_v51 }
 0x234   : > { %2277 = vrcp.f32 %v2963_v16  ;;  %v2274_v55 = vpop.eup %2273  ;;  %v2977_v59 = vadd.f32 1.0, %v1019_v26  ;;  %v2993_v9 = vmul.f32 0.70710677, %v2983_v5  ;;  %v1659_v44 = vmul.f32 1.442695, %v1626_v6 }
 0x235   : > { %2279 = vrcp.f32 %v2973_v20  ;;  %v2276_v42 = vpop.eup %2275  ;;  %v1113_v37 = vmul.f32 %v2274_v55, %v2947_v46  ;;  %v2986_v62 = vadd.f32 1.0, %v1020_v19  ;;  %v3000_v1 = vmul.f32 0.70710677, %v2990_v63 }
 0x236   : > { %2281 = vrcp.f32 %v2977_v59  ;;  %v1114_v22 = vmul.f32 %v2276_v42, %v2956_v52  ;;  %v1009_v39 = vand.u32 2147483647, %v2993_v9  ;;  %v1701_v48 = vmul.f32 1.442695, %v1647_v21 }
 0x237   : > { %v1145_v35 = vsub.f32 2.0, %v1113_v37  ;;  %2283 = vrcp.f32 %v2986_v62  ;;  %3929 = vst [vmem:[#allocation10_spill] sm:$0xff] %v3000_v1  ;;  %v1595_v43 = vsub.f32 0.0, %v987_v34  ;;  %v3005_v51 = vmul.f32 0.5, %v2939_v38  ;;  %v846_v38 = vpop.f32.mrf.mxu0 }
 0x238   : > { %v1041_v53 = vmul.f32 0.3275911, %v1009_v39  ;;  %v1146_v26 = vsub.f32 2.0, %v1114_v22  ;;  %v1596_v54 = vsub.f32 0.0, %v988_v32  ;;  %v3008_v56 = vand.u32 2147483647, %v3000_v1 }
 0x239   : > { %v1177_v19 = vmul.f32 %v2274_v55, %v1145_v35  ;;  %v1699_v60 = vmul.f32 1.442695, %v1646_v36  ;;  %2285 = vpow2.f32 %v1659_v44  ;;  %v3014_v3 = vmul.f32 0.5, %v2942_v41  ;;  %v911_v35 = vpop.f32.mrf.mxu1  ;;  %v879_v41 = vpop.f32.mrf.mxu2 }
 0x23a   : > { %v2278_v7 = vpop.eup %2277  ;;  %v3011_v37 = vadd.f32 1.0, %v1041_v53  ;;  %v1040_v6 = vmul.f32 0.3275911, %v3008_v56  ;;  %2287 = vpow2.f32 %v1701_v48  ;;  %v1627_v15 = vmul.f32 %v1595_v43, %v987_v34 }
 0x23b   : > { %v2280_v31 = vpop.eup %2279  ;;  %v1135_v27 = vmul.f32 %v2278_v7, %v2963_v16  ;;  %3931 = vst [vmem:[#allocation12_spill] sm:$0xff] %v3014_v3  ;;  %v3019_v55 = vmul.f32 0.5, %v2961_v24  ;;  %v1178_v36 = vmul.f32 %v2276_v42, %v1146_v26  ;;  %v1628_v53 = vmul.f32 %v1596_v54, %v988_v32 }
 0x23c   : > { %v2282_v49 = vpop.eup %2281  ;;  %v1134_v58 = vmul.f32 %v2280_v31, %v2973_v20  ;;  %2289 = vrcp.f32 %v3011_v37  ;;  %v3022_v44 = vadd.f32 1.0, %v1040_v6  ;;  %v3025_v50 = vadd.f32 %v846_v38, %v707_v0 }
 0x23d   : > { %v1167_v30 = vsub.f32 2.0, %v1135_v27  ;;  %v2284_v21 = vpop.eup %2283  ;;  %v1115_v22 = vmul.f32 %v2282_v49, %v2977_v59  ;;  %3932 = vst [vmem:[#allocation13_spill] sm:$0xff] %v3019_v55  ;;  %v1209_v27 = vmul.f32 %v1177_v19, %v2947_v46  ;;  %2291 = vpow2.f32 %v1699_v60 }
 0x23e   : > { %v1166_v12 = vsub.f32 2.0, %v1134_v58  ;;  %3933 = vst [vmem:[#allocation14_spill] sm:$0xff] %v3025_v50  ;;  %v1116_v34 = vmul.f32 %v2284_v21, %v2986_v62  ;;  %v1617_v43 = vsub.f32 0.0, %v1009_v39  ;;  %v3028_v24 = vadd.f32 %v911_v35, %v707_v0 }
 0x23f   : > { %v1199_v48 = vmul.f32 %v2278_v7, %v1167_v30  ;;  %v1147_v23 = vsub.f32 2.0, %v1115_v22  ;;  %2293 = vrcp.f32 %v3022_v44  ;;  %v3032_v32 = vmul.f32 0.70710677, %v3025_v50  ;;  %v3037_v46 = vpop.eup %2285 }
 0x240   : > { %v3035_v42 = vadd.f32 %v879_v41, %v2926_v33  ;;  %3935 = vst [vmem:[#allocation16_spill] sm:$0xff] %v3037_v46  ;;  %v1210_v26 = vmul.f32 %v1178_v36, %v2956_v52  ;;  %v3040_v54 = vmul.f32 1.442695, %v1627_v15  ;;  %v1663_v7 = vmul.f32 1.442695, %v1628_v53  ;;  %v3045_v60 = vpop.eup %2287 }
 0x241   : > { %3934 = vst [vmem:[#allocation15_spill] sm:$0xff] %v3032_v32  ;;  %v3043_v58 = vmul.f32 0.70710677, %v3028_v24  ;;  %v1241_v30 = vsub.f32 2.0, %v1209_v27  ;;  %v1198_v6 = vmul.f32 %v2280_v31, %v1166_v12  ;;  %v989_v0 = vand.u32 2147483647, %v3032_v32 }
 0x242   : > { %3936 = vst [vmem:[#allocation17_spill] sm:$0xff] %v3040_v54  ;;  %v3049_v38 = vmul.f32 0.70710677, %v3035_v42  ;;  %v2290_v22 = vpop.eup %2289  ;;  %v1231_v35 = vmul.f32 %v1199_v48, %v2963_v16  ;;  %v1649_v41 = vmul.f32 %v1617_v43, %v1009_v39  ;;  %v1616_v15 = vsub.f32 0.0, %v3008_v56 }
 0x243   : > { %3937 = vst [vmem:[#allocation18_spill] sm:$0xff] %v3043_v58  ;;  %v3054_v52 = vand.u32 2147483647, %v3043_v58  ;;  %v3056_v53 = vpop.eup %2291  ;;  %v3058_v50 = vmul.f32 %v2282_v49, %v1147_v23  ;;  %v1148_v27 = vsub.f32 2.0, %v1116_v34  ;;  %v1021_v12 = vmul.f32 0.3275911, %v989_v0 }
 0x244   : > { %3938 = vst [vmem:[#allocation19_spill] sm:$0xff] %v3056_v53  ;;  %v3061_v31 = vand.u32 2147483647, %v3049_v38  ;;  %v1242_v32 = vsub.f32 2.0, %v1210_v26  ;;  %2295 = vpow2.f32 %v1663_v7  ;;  %v3064_v54 = vmul.f32 0.5, %v2983_v5  ;;  %v941_v5 = vpop.f32.mrf.mxu3 }
 0x245   : > { %v1022_v16 = vmul.f32 0.3275911, %v3054_v52  ;;  %v2294_v39 = vpop.eup %2293  ;;  %v1230_v43 = vmul.f32 %v1198_v6, %v2973_v20  ;;  %v1137_v28 = vmul.f32 %v2290_v22, %v3011_v37  ;;  %v3069_v25 = vadd.f32 1.0, %v1021_v12  ;;  %v849_v20 = vpop.f32.mrf.mxu0 }
 0x246   : > { %v1043_v23 = vmul.f32 0.3275911, %v3061_v31  ;;  %v3072_v49 = vmul.f32 %v1241_v30, %v1177_v19  ;;  %v1263_v34 = vsub.f32 2.0, %v1231_v35  ;;  %v1648_v26 = vmul.f32 %v1616_v15, %v3008_v56 }
 0x247   : > { %v3075_v7 = vadd.f32 1.0, %v1022_v16  ;;  %v1211_v55 = vmul.f32 %v3058_v50, %v2977_v59  ;;  %v1180_v46 = vmul.f32 %v2284_v21, %v1148_v27  ;;  %v1705_v29 = vmul.f32 1.442695, %v1649_v41 }
 0x248   : > { %3939 = vst [vmem:[#allocation20_spill] sm:$0xff] %v3072_v49  ;;  %2297 = vrcp.f32 %v3069_v25  ;;  %v3080_v12 = vmul.f32 %v1242_v32, %v1178_v36  ;;  %v1136_v14 = vmul.f32 %v2294_v39, %v3022_v44  ;;  %v3084_v19 = vmul.f32 0.5, %v2990_v63  ;;  %v914_v63 = vpop.f32.mrf.mxu1 }
 0x249   : > { %v3086_v30 = vadd.f32 1.0, %v1043_v23  ;;  %v1262_v56 = vsub.f32 2.0, %v1230_v43  ;;  %v1169_v35 = vsub.f32 2.0, %v1137_v28  ;;  %v1597_v15 = vsub.f32 0.0, %v989_v0 }
 0x24a   : > { %3940 = vst [vmem:[#allocation21_spill] sm:$0xff] %v3080_v12  ;;  %v3089_v16 = vadd.f32 %v941_v5, %v2912_v17  ;;  %v3091_v59 = vpop.eup %2295  ;;  %v3093_v21 = vmul.f32 %v1263_v34, %v1199_v48  ;;  %v1703_v41 = vmul.f32 1.442695, %v1648_v26  ;;  %2299 = vrcp.f32 %v3075_v7 }
 0x24b   : > { %3941 = vst [vmem:[#allocation22_spill] sm:$0xff] %v3084_v19  ;;  %v3097_v36 = vadd.f32 %v849_v20, %v2918_v61  ;;  %v1243_v32 = vsub.f32 2.0, %v1211_v55  ;;  %v1212_v27 = vmul.f32 %v1180_v46, %v2986_v62  ;;  %2301 = vpow2.f32 %v1705_v29 }
 0x24c   : > { %3942 = vst [vmem:[#allocation23_spill] sm:$0xff] %v3091_v59  ;;  %v3101_v28 = vmul.f32 0.70710677, %v3089_v16  ;;  %v1168_v17 = vsub.f32 2.0, %v1136_v14  ;;  %v1598_v43 = vsub.f32 0.0, %v3054_v52  ;;  %2303 = vrcp.f32 %v3086_v30 }
 0x24d   : > { %3943 = vst [vmem:[#allocation24_spill] sm:$0xff] %v3097_v36  ;;  %v3106_v48 = vmul.f32 0.70710677, %v3097_v36  ;;  %v1201_v34 = vmul.f32 %v2290_v22, %v1169_v35  ;;  %v1629_v26 = vmul.f32 %v1597_v15, %v989_v0  ;;  %v3110_v55 = vadd.f32 %v914_v63, %v2918_v61  ;;  %v882_v0 = vpop.f32.mrf.mxu2 }
 0x24e   : > { %3944 = vst [vmem:[#allocation25_spill] sm:$0xff] %v3101_v28  ;;  %v2298_v23 = vpop.eup %2297  ;;  %v1010_v5 = vand.u32 2147483647, %v3101_v28  ;;  %v3112_v29 = vmul.f32 %v1262_v56, %v1198_v6  ;;  %2305 = vpow2.f32 %v1703_v41  ;;  %v1619_v14 = vsub.f32 0.0, %v3061_v31 }
 0x24f   : > { %3945 = vst [vmem:[#allocation26_spill] sm:$0xff] %v3106_v48  ;;  %v991_v62 = vand.u32 2147483647, %v3106_v48  ;;  %v1244_v20 = vsub.f32 2.0, %v1212_v27  ;;  %v1117_v49 = vmul.f32 %v2298_v23, %v3069_v25  ;;  %v3118_v36 = vmul.f32 0.5, %v3028_v24 }
 0x250   : > { %v1042_v22 = vmul.f32 0.3275911, %v1010_v5  ;;  %v2300_v35 = vpop.eup %2299  ;;  %v1200_v15 = vmul.f32 %v2294_v39, %v1168_v17  ;;  %v1630_v61 = vmul.f32 %v1598_v43, %v3054_v52  ;;  %v3122_v6 = vmul.f32 0.70710677, %v3110_v55 }
 0x251   : > { %3946 = vst [vmem:[#allocation27_spill] sm:$0xff] %v3118_v36  ;;  %v1023_v63 = vmul.f32 0.3275911, %v991_v62  ;;  %v3124_v56 = vpop.eup %2301  ;;  %v3127_v41 = vmul.f32 %v1243_v32, %v3058_v50  ;;  %v1233_v27 = vmul.f32 %v1201_v34, %v3011_v37  ;;  %v1665_v48 = vmul.f32 1.442695, %v1629_v26 }
 0x252   : > { %3947 = vst [vmem:[#allocation28_spill] sm:$0xff] %v3122_v6  ;;  %v3130_v24 = vadd.f32 1.0, %v1042_v22  ;;  %v2304_v36 = vpop.eup %2303  ;;  %v1651_v59 = vmul.f32 %v1619_v14, %v3061_v31  ;;  %v1618_v39 = vsub.f32 0.0, %v1010_v5  ;;  %v3136_v52 = vadd.f32 %v882_v0, %v2903_v8  ;;  %v944_v0 = vpop.f32.mrf.mxu3 }
 0x253   : > { %3948 = vst [vmem:[#allocation29_spill] sm:$0xff] %v3127_v41  ;;  %v3133_v17 = vadd.f32 1.0, %v1023_v63  ;;  %v1149_v43 = vsub.f32 2.0, %v1117_v49  ;;  %v1118_v58 = vmul.f32 %v2300_v35, %v3075_v7  ;;  %v992_v50 = vand.u32 2147483647, %v3122_v6 }
 0x254   : > { %2307 = vrcp.f32 %v3130_v24  ;;  %v3141_v37 = vpop.eup %2305  ;;  %v3143_v32 = vmul.f32 %v1244_v20, %v1180_v46  ;;  %v1232_v26 = vmul.f32 %v1200_v15, %v3022_v44  ;;  %v1667_v31 = vmul.f32 1.442695, %v1630_v61 }
 0x255   : > { %3949 = vst [vmem:[#allocation30_spill] sm:$0xff] %v3141_v37  ;;  %2309 = vrcp.f32 %v3133_v17  ;;  %v1139_v14 = vmul.f32 %v2304_v36, %v3086_v30  ;;  %v1599_v22 = vsub.f32 0.0, %v991_v62  ;;  %v1024_v49 = vmul.f32 0.3275911, %v992_v50 }
 0x256   : > { %3950 = vst [vmem:[#allocation31_spill] sm:$0xff] %v3143_v32  ;;  %2311 = vpow2.f32 %v1665_v48  ;;  %v1265_v63 = vsub.f32 2.0, %v1233_v27  ;;  %v1709_v41 = vmul.f32 1.442695, %v1651_v59  ;;  %v3149_v12 = vmul.f32 0.5, %v3035_v42 }
 0x257   : > { %v1650_v6 = vmul.f32 %v1618_v39, %v1010_v5  ;;  %v1181_v3 = vmul.f32 %v2298_v23, %v1149_v43  ;;  %v1150_v46 = vsub.f32 2.0, %v1118_v58  ;;  %v3151_v20 = vadd.f32 1.0, %v1024_v49 }
 0x258   : > { %v3154_v44 = vmul.f32 0.70710677, %v3136_v52  ;;  %v1264_v61 = vsub.f32 2.0, %v1232_v26  ;;  %2313 = vpow2.f32 %v1667_v31  ;;  %v3157_v48 = vmul.f32 0.5, %v3089_v16 }
 0x259   : > { %v3160_v32 = vadd.f32 %v944_v0, %v2926_v33  ;;  %v1171_v27 = vsub.f32 2.0, %v1139_v14  ;;  %v1631_v42 = vmul.f32 %v1599_v22, %v991_v62  ;;  %2315 = vrcp.f32 %v3151_v20  ;;  %v852_v14 = vpop.f32.mrf.mxu0 }
 0x25a   : > { %3951 = vst [vmem:[#allocation32_spill] sm:$0xff] %v3157_v48  ;;  %v2308_v59 = vpop.eup %2307  ;;  %v1013_v58 = vand.u32 2147483647, %v3154_v44  ;;  %v3164_v5 = vmul.f32 %v1265_v63, %v1201_v34  ;;  %v1707_v43 = vmul.f32 1.442695, %v1650_v6  ;;  %v1213_v33 = vmul.f32 %v1181_v3, %v3069_v25  ;;  %v917_v63 = vpop.f32.mrf.mxu1 }
 0x25b   : > { %v2310_v23 = vpop.eup %2309  ;;  %v1138_v39 = vmul.f32 %v2308_v59, %v3130_v24  ;;  %v3168_v26 = vmul.f32 0.70710677, %v3160_v32  ;;  %v1182_v31 = vmul.f32 %v2300_v35, %v1150_v46  ;;  %2317 = vpow2.f32 %v1709_v41 }
 0x25c   : > { %v3170_v16 = vpop.eup %2311  ;;  %v1045_v62 = vmul.f32 0.3275911, %v1013_v58  ;;  %v3173_v22 = vmul.f32 %v1264_v61, %v1200_v15  ;;  %v1119_v49 = vmul.f32 %v2310_v23, %v3133_v17  ;;  %v1600_v34 = vsub.f32 0.0, %v992_v50 }
 0x25d   : > { %3952 = vst [vmem:[#allocation33_spill] sm:$0xff] %v3168_v26  ;;  %v1012_v0 = vand.u32 2147483647, %v3168_v26  ;;  %v1203_v6 = vmul.f32 %v2304_v36, %v1171_v27  ;;  %v1170_v19 = vsub.f32 2.0, %v1138_v39  ;;  %v1669_v48 = vmul.f32 1.442695, %v1631_v42 }
 0x25e   : > { %3953 = vst [vmem:[#allocation34_spill] sm:$0xff] %v3170_v16  ;;  %v3177_v53 = vadd.f32 1.0, %v1045_v62  ;;  %v3179_v16 = vpop.eup %2313  ;;  %2319 = vpow2.f32 %v1707_v43  ;;  %v1621_v25 = vsub.f32 0.0, %v1013_v58  ;;  %v3182_v41 = vadd.f32 %v852_v14, %v2922_v13 }
 0x25f   : > { %3954 = vst [vmem:[#allocation35_spill] sm:$0xff] %v3179_v16  ;;  %v1044_v35 = vmul.f32 0.3275911, %v1012_v0  ;;  %v2316_v15 = vpop.eup %2315  ;;  %v1245_v46 = vsub.f32 2.0, %v1213_v33  ;;  %v1214_v61 = vmul.f32 %v1182_v31, %v3075_v7  ;;  %v3187_v36 = vadd.f32 %v917_v63, %v2922_v13 }
 0x260   : > { %3955 = vst [vmem:[#allocation36_spill] sm:$0xff] %v3182_v41  ;;  %2321 = vrcp.f32 %v3177_v53  ;;  %v1151_v27 = vsub.f32 2.0, %v1119_v49  ;;  %v1120_v42 = vmul.f32 %v2316_v15, %v3151_v20  ;;  %v1632_v39 = vmul.f32 %v1600_v34, %v992_v50 }
 0x261   : > { %v3190_v62 = vadd.f32 1.0, %v1044_v35  ;;  %v3192_v43 = vpop.eup %2317  ;;  %v1235_v14 = vmul.f32 %v1203_v6, %v3086_v30  ;;  %v1202_v16 = vmul.f32 %v2308_v59, %v1170_v19  ;;  %2323 = vpow2.f32 %v1669_v48  ;;  %v885_v30 = vpop.f32.mrf.mxu2 }
 0x262   : > { %v3196_v33 = vmul.f32 0.70710677, %v3182_v41  ;;  %v3199_v7 = vmul.f32 0.5, %v3110_v55  ;;  %v1653_v13 = vmul.f32 %v1621_v25, %v1013_v58  ;;  %v1620_v49 = vsub.f32 0.0, %v1012_v0 }
 0x263   : > { %2325 = vrcp.f32 %v3190_v62  ;;  %v1246_v63 = vsub.f32 2.0, %v1214_v61  ;;  %v1152_v50 = vsub.f32 2.0, %v1120_v42  ;;  %v3204_v35 = vmul.f32 0.70710677, %v3187_v36 }
 0x264   : > { %3956 = vst [vmem:[#allocation37_spill] sm:$0xff] %v3196_v33  ;;  %v993_v34 = vand.u32 2147483647, %v3196_v33  ;;  %v3206_v19 = vpop.eup %2319  ;;  %v3208_v48 = vmul.f32 %v1245_v46, %v1181_v3  ;;  %v1183_v59 = vmul.f32 %v2310_v23, %v1151_v27  ;;  %v1671_v41 = vmul.f32 1.442695, %v1632_v39 }
 0x265   : > { %3957 = vst [vmem:[#allocation38_spill] sm:$0xff] %v3199_v7  ;;  %v3211_v55 = vmul.f32 0.5, %v3136_v52  ;;  %v1267_v25 = vsub.f32 2.0, %v1235_v14  ;;  %v1234_v61 = vmul.f32 %v1202_v16, %v3130_v24  ;;  %v994_v33 = vand.u32 2147483647, %v3204_v35 }
 0x266   : > { %3958 = vst [vmem:[#allocation39_spill] sm:$0xff] %v3204_v35  ;;  %v2322_v58 = vpop.eup %2321  ;;  %v1025_v42 = vmul.f32 0.3275911, %v993_v34  ;;  %v1713_v37 = vmul.f32 1.442695, %v1653_v13  ;;  %v1652_v47 = vmul.f32 %v1620_v49, %v1012_v0  ;;  %v886_v1 = vadd.f32 %v885_v30, %v2908_v2  ;;  %v947_v35 = vpop.f32.mrf.mxu3 }
 0x267   : > { %3959 = vst [vmem:[#allocation40_spill] sm:$0xff] %v3206_v19  ;;  %v1141_v7 = vmul.f32 %v2322_v58, %v3177_v53  ;;  %v3217_v3 = vpop.eup %2323  ;;  %v1184_v23 = vmul.f32 %v2316_v15, %v1152_v50  ;;  %v1601_v52 = vsub.f32 0.0, %v993_v34  ;;  %v1026_v27 = vmul.f32 0.3275911, %v994_v33 }
 0x268   : > { %3960 = vst [vmem:[#allocation41_spill] sm:$0xff] %v3208_v48  ;;  %v3219_v46 = vadd.f32 1.0, %v1025_v42  ;;  %v3221_v14 = vmul.f32 %v1246_v63, %v1182_v31  ;;  %v1215_v24 = vmul.f32 %v1183_v59, %v3133_v17  ;;  %2327 = vpow2.f32 %v1671_v41  ;;  %v855_v63 = vpop.f32.mrf.mxu0 }
 0x269   : > { %3961 = vst [vmem:[#allocation42_spill] sm:$0xff] %v3217_v3  ;;  %v2326_v39 = vpop.eup %2325  ;;  %v3224_v48 = vmul.f32 0.70710677, %v886_v1  ;;  %v1266_v13 = vsub.f32 2.0, %v1234_v61  ;;  %v3228_v49 = vadd.f32 1.0, %v1026_v27  ;;  %v3230_v15 = vmul.f32 %v1267_v25, %v1203_v6 }
 0x26a   : > { %3962 = vst [vmem:[#allocation43_spill] sm:$0xff] %v3221_v14  ;;  %v1140_v0 = vmul.f32 %v2326_v39, %v3190_v62  ;;  %2329 = vrcp.f32 %v3219_v46  ;;  %v1173_v50 = vsub.f32 2.0, %v1141_v7  ;;  %v1711_v30 = vmul.f32 1.442695, %v1652_v47 }
 0x26b   : > { %v1015_v31 = vand.u32 2147483647, %v3224_v48  ;;  %v1216_v17 = vmul.f32 %v1184_v23, %v3151_v20  ;;  %2331 = vpow2.f32 %v1713_v37  ;;  %v1633_v41 = vmul.f32 %v1601_v52, %v993_v34 }
 0x26c   : > { %v948_v42 = vadd.f32 %v947_v35, %v2903_v8  ;;  %v1172_v61 = vsub.f32 2.0, %v1140_v0  ;;  %v3236_v3 = vmul.f32 0.5, %v3160_v32  ;;  %2333 = vrcp.f32 %v3228_v49 }
 0x26d   : > { %v1047_v27 = vmul.f32 0.3275911, %v1015_v31  ;;  %v3239_v6 = vmul.f32 %v1266_v13, %v1202_v16  ;;  %v1247_v7 = vsub.f32 2.0, %v1215_v24  ;;  %v1602_v47 = vsub.f32 0.0, %v994_v33 }
 0x26e   : > { %3963 = vst [vmem:[#allocation44_spill] sm:$0xff] %v3236_v3  ;;  %v3241_v25 = vmul.f32 0.70710677, %v948_v42  ;;  %v3243_v14 = vpop.eup %2327  ;;  %v1205_v20 = vmul.f32 %v2322_v58, %v1173_v50  ;;  %2335 = vpow2.f32 %v1711_v30  ;;  %v856_v8 = vadd.f32 %v855_v63, %v2980_v4  ;;  %v920_v58 = vpop.f32.mrf.mxu1 }
 0x26f   : > { %3965 = vst [vmem:[#allocation46_spill] sm:$0xff] %v3243_v14  ;;  %v3245_v37 = vadd.f32 1.0, %v1047_v27  ;;  %v1248_v32 = vsub.f32 2.0, %v1216_v17  ;;  %v1673_v35 = vmul.f32 1.442695, %v1633_v41  ;;  %v3249_v52 = vmul.f32 0.5, %v3187_v36  ;;  %v950_v14 = vpop.f32.mrf.mxu3 }
 0x270   : > { %3964 = vst [vmem:[#allocation45_spill] sm:$0xff] %v3241_v25  ;;  %v2330_v34 = vpop.eup %2329  ;;  %v1014_v16 = vand.u32 2147483647, %v3241_v25  ;;  %v1204_v24 = vmul.f32 %v2326_v39, %v1172_v61  ;;  %v3254_v0 = vmul.f32 0.70710677, %v856_v8  ;;  %v3258_v30 = vmul.f32 %v1247_v7, %v1183_v59 }
 0x271   : > { %3966 = vst [vmem:[#allocation47_spill] sm:$0xff] %v3249_v52  ;;  %v1121_v13 = vmul.f32 %v2330_v34, %v3219_v46  ;;  %2337 = vrcp.f32 %v3245_v37  ;;  %v3256_v50 = vpop.eup %2331  ;;  %v1634_v63 = vmul.f32 %v1602_v47, %v994_v33  ;;  %v3260_v17 = vmul.f32 0.5, %v886_v1 }
 0x272   : > { %3967 = vst [vmem:[#allocation48_spill] sm:$0xff] %v3254_v0  ;;  %v1046_v41 = vmul.f32 0.3275911, %v1014_v16  ;;  %v2334_v36 = vpop.eup %2333  ;;  %v1237_v27 = vmul.f32 %v1205_v20, %v3177_v53  ;;  %v1623_v39 = vsub.f32 0.0, %v1015_v31  ;;  %v995_v61 = vand.u32 2147483647, %v3254_v0  ;;  %v858_v53 = vpop.f32.mrf.mxu0 }
 0x273   : > { %3968 = vst [vmem:[#allocation49_spill] sm:$0xff] %v3258_v30  ;;  %v1153_v52 = vsub.f32 2.0, %v1121_v13  ;;  %v3264_v3 = vmul.f32 %v1248_v32, %v1184_v23  ;;  %2339 = vpow2.f32 %v1673_v35  ;;  %v1122_v19 = vmul.f32 %v2334_v36, %v3228_v49 }
 0x274   : > { %v3267_v28 = vadd.f32 1.0, %v1046_v41  ;;  %v3269_v59 = vpop.eup %2335  ;;  %v1236_v1 = vmul.f32 %v1204_v24, %v3190_v62  ;;  %v1622_v7 = vsub.f32 0.0, %v1014_v16  ;;  %v1027_v47 = vmul.f32 0.3275911, %v995_v61 }
 0x275   : > { %3969 = vst [vmem:[#allocation50_spill] sm:$0xff] %v3264_v3  ;;  %v1185_v33 = vmul.f32 %v2330_v34, %v1153_v52  ;;  %v1154_v13 = vsub.f32 2.0, %v1122_v19  ;;  %v921_v0 = vadd.f32 %v920_v58, %v2980_v4  ;;  %v3275_v23 = vadd.f32 %v950_v14, %v2908_v2 }
 0x276   : > { %3970 = vst [vmem:[#allocation51_spill] sm:$0xff] %v3269_v59  ;;  %2341 = vrcp.f32 %v3267_v28  ;;  %v1269_v35 = vsub.f32 2.0, %v1237_v27  ;;  %v1675_v41 = vmul.f32 1.442695, %v1634_v63  ;;  %v1655_v30 = vmul.f32 %v1623_v39, %v1015_v31 }
 0x277   : > { %v2338_v32 = vpop.eup %2337  ;;  %v3277_v3 = vadd.f32 1.0, %v1027_v47  ;;  %v3280_v34 = vmul.f32 0.5, %v948_v42  ;;  %v1603_v52 = vsub.f32 0.0, %v995_v61  ;;  %v3282_v59 = vmul.f32 0.70710677, %v921_v0 }
 0x278   : > { %v1143_v62 = vmul.f32 %v2338_v32, %v3245_v37  ;;  %v1268_v19 = vsub.f32 2.0, %v1236_v1  ;;  %v1186_v26 = vmul.f32 %v2334_v36, %v1154_v13  ;;  %v1654_v25 = vmul.f32 %v1622_v7, %v1014_v16  ;;  %v923_v36 = vpop.f32.mrf.mxu1 }
 0x279   : > { %3971 = vst [vmem:[#allocation52_spill] sm:$0xff] %v3280_v34  ;;  %v3285_v4 = vmul.f32 0.70710677, %v3275_v23  ;;  %v3287_v2 = vpop.eup %2339  ;;  %v1217_v14 = vmul.f32 %v1185_v33, %v3219_v46  ;;  %2343 = vrcp.f32 %v3277_v3  ;;  %v996_v58 = vand.u32 2147483647, %v3282_v59 }
 0x27a   : > { %3972 = vst [vmem:[#allocation53_spill] sm:$0xff] %v3282_v59  ;;  %v1175_v31 = vsub.f32 2.0, %v1143_v62  ;;  %v3292_v42 = vmul.f32 %v1269_v35, %v1205_v20  ;;  %2345 = vpow2.f32 %v1675_v41  ;;  %v1717_v63 = vmul.f32 1.442695, %v1655_v30 }
 0x27b   : > { %3973 = vst [vmem:[#allocation54_spill] sm:$0xff] %v3287_v2  ;;  %v1016_v27 = vand.u32 2147483647, %v3285_v4  ;;  %v1635_v1 = vmul.f32 %v1603_v52, %v995_v61  ;;  %v3295_v7 = vmul.f32 0.5, %v856_v8  ;;  %v1028_v47 = vmul.f32 0.3275911, %v996_v58  ;;  %v861_v61 = vpop.f32.mrf.mxu0 }
 0x27c   : > { %v2342_v16 = vpop.eup %2341  ;;  %v1207_v39 = vmul.f32 %v2338_v32, %v1175_v31  ;;  %v1218_v46 = vmul.f32 %v1186_v26, %v3228_v49  ;;  %v1604_v62 = vsub.f32 0.0, %v996_v58  ;;  %v3299_v59 = vmul.f32 %v1268_v19, %v1204_v24 }
 0x27d   : > { %3974 = vst [vmem:[#allocation55_spill] sm:$0xff] %v3295_v7  ;;  %v1142_v13 = vmul.f32 %v2342_v16, %v3267_v28  ;;  %v1048_v2 = vmul.f32 0.3275911, %v1016_v27  ;;  %v1249_v20 = vsub.f32 2.0, %v1217_v14  ;;  %v1715_v35 = vmul.f32 1.442695, %v1654_v25 }
 0x27e   : > { %v3301_v30 = vadd.f32 1.0, %v1028_v47  ;;  %v1239_v41 = vmul.f32 %v1207_v39, %v3245_v37  ;;  %2347 = vpow2.f32 %v1717_v63  ;;  %v1624_v8 = vsub.f32 0.0, %v1016_v27 }
 0x27f   : > { %v3304_v32 = vadd.f32 1.0, %v1048_v2  ;;  %v2344_v52 = vpop.eup %2343  ;;  %v1174_v31 = vsub.f32 2.0, %v1142_v13  ;;  %v1677_v49 = vmul.f32 1.442695, %v1635_v1  ;;  %v859_v7 = vadd.f32 %v858_v53, %v2914_v18 }
 0x280   : > { %2349 = vrcp.f32 %v3301_v30  ;;  %v3308_v24 = vpop.eup %2345  ;;  %v1250_v19 = vsub.f32 2.0, %v1218_v46  ;;  %v1123_v25 = vmul.f32 %v2344_v52, %v3277_v3  ;;  %v1636_v14 = vmul.f32 %v1604_v62, %v996_v58 }
 0x281   : > { %3975 = vst [vmem:[#allocation56_spill] sm:$0xff] %v3308_v24  ;;  %2351 = vrcp.f32 %v3304_v32  ;;  %v3312_v37 = vmul.f32 %v1249_v20, %v1185_v33  ;;  %v3314_v2 = vmul.f32 0.5, %v921_v0  ;;  %v3316_v63 = vmul.f32 0.70710677, %v859_v7 }
 0x282   : > { %2353 = vpow2.f32 %v1715_v35  ;;  %v1271_v1 = vsub.f32 2.0, %v1239_v41  ;;  %v1155_v47 = vsub.f32 2.0, %v1123_v25  ;;  %v1656_v13 = vmul.f32 %v1624_v8, %v1016_v27 }
 0x283   : > { %3976 = vst [vmem:[#allocation57_spill] sm:$0xff] %v3312_v37  ;;  %v924_v53 = vadd.f32 %v923_v36, %v2914_v18  ;;  %v1206_v34 = vmul.f32 %v2342_v16, %v1174_v31  ;;  %2355 = vpow2.f32 %v1677_v49  ;;  %v997_v46 = vand.u32 2147483647, %v3316_v63  ;;  %v926_v37 = vpop.f32.mrf.mxu1 }
 0x284   : > { %3977 = vst [vmem:[#allocation58_spill] sm:$0xff] %v3314_v2  ;;  %v862_v58 = vadd.f32 %v861_v61, %v2920_v10  ;;  %v3321_v62 = vpop.eup %2347  ;;  %v3323_v33 = vmul.f32 %v1250_v19, %v1186_v26  ;;  %v1187_v20 = vmul.f32 %v2344_v52, %v1155_v47  ;;  %v1679_v0 = vmul.f32 1.442695, %v1636_v14  ;;  %v864_v2 = vpop.f32.mrf.mxu0 }
 0x285   : > { %3978 = vst [vmem:[#allocation59_spill] sm:$0xff] %v3316_v63  ;;  %v3325_v35 = vmul.f32 0.70710677, %v924_v53  ;;  %v3328_v27 = vmul.f32 0.5, %v3275_v23  ;;  %v1029_v18 = vmul.f32 0.3275911, %v997_v46  ;;  %v3332_v31 = vmul.f32 %v1271_v1, %v1207_v39 }
 0x286   : > { %3979 = vst [vmem:[#allocation60_spill] sm:$0xff] %v3323_v33  ;;  %v2350_v41 = vpop.eup %2349  ;;  %v1605_v36 = vsub.f32 0.0, %v997_v46  ;;  %v3330_v16 = vmul.f32 0.70710677, %v862_v58  ;;  %v1719_v26 = vmul.f32 1.442695, %v1656_v13  ;;  %v1238_v19 = vmul.f32 %v1206_v34, %v3267_v28 }
 0x287   : > { %3980 = vst [vmem:[#allocation61_spill] sm:$0xff] %v3325_v35  ;;  %v2352_v8 = vpop.eup %2351  ;;  %v1124_v61 = vmul.f32 %v2350_v41, %v3301_v30  ;;  %v998_v52 = vand.u32 2147483647, %v3325_v35  ;;  %v3340_v23 = vadd.f32 1.0, %v1029_v18  ;;  %v3343_v14 = vadd.f32 %v926_v37, %v2920_v10 }
 0x288   : > { %3981 = vst [vmem:[#allocation62_spill] sm:$0xff] %v3328_v27  ;;  %v3336_v49 = vpop.eup %2353  ;;  %v1144_v25 = vmul.f32 %v2352_v8, %v3304_v32  ;;  %v1219_v47 = vmul.f32 %v1187_v20, %v3277_v3  ;;  %v1637_v35 = vmul.f32 %v1605_v36, %v997_v46  ;;  %v999_v28 = vand.u32 2147483647, %v3330_v16 }
 0x289   : > { %3982 = vst [vmem:[#allocation63_spill] sm:$0xff] %v3330_v16  ;;  %v1156_v39 = vsub.f32 2.0, %v1124_v61  ;;  %v1030_v1 = vmul.f32 0.3275911, %v998_v52  ;;  %v1606_v63 = vsub.f32 0.0, %v998_v52  ;;  %v3346_v13 = vpop.eup %2355  ;;  %2357 = vrcp.f32 %v3340_v23 }
 0x28a   : > { %3983 = vst [vmem:[#allocation64_spill] sm:$0xff] %v3336_v49  ;;  %v1176_v24 = vsub.f32 2.0, %v1144_v25  ;;  %2359 = vpow2.f32 %v1679_v0  ;;  %v1270_v37 = vsub.f32 2.0, %v1238_v19  ;;  %v1031_v61 = vmul.f32 0.3275911, %v999_v28 }
 0x28b   : > { %3984 = vst [vmem:[#allocation65_spill] sm:$0xff] %v3346_v13  ;;  %v3350_v33 = vmul.f32 %v2350_v41, %v1156_v39  ;;  %v3352_v18 = vadd.f32 1.0, %v1030_v1  ;;  %v1638_v10 = vmul.f32 %v1606_v63, %v998_v52  ;;  %2361 = vpow2.f32 %v1719_v26  ;;  %v929_v1 = vpop.f32.mrf.mxu1 }
 0x28c   : > { %v1208_v3 = vmul.f32 %v2352_v8, %v1176_v24  ;;  %v1251_v27 = vsub.f32 2.0, %v1219_v47  ;;  %v3354_v49 = vmul.f32 0.5, %v859_v7  ;;  %v1607_v25 = vsub.f32 0.0, %v999_v28 }
 0x28d   : > { %2363 = vrcp.f32 %v3352_v18  ;;  %v1220_v46 = vmul.f32 %v3350_v33, %v3301_v30  ;;  %v1681_v36 = vmul.f32 1.442695, %v1637_v35  ;;  %v3359_v41 = vadd.f32 1.0, %v1031_v61 }
 0x28e   : > { %3985 = vst [vmem:[#allocation66_spill] sm:$0xff] %v3354_v49  ;;  %v3362_v0 = vmul.f32 0.70710677, %v3343_v14  ;;  %v1240_v63 = vmul.f32 %v1208_v3, %v3304_v32  ;;  %v1683_v24 = vmul.f32 1.442695, %v1638_v10  ;;  %v3365_v8 = vmul.f32 0.5, %v924_v53 }
 0x28f   : > { %v865_v7 = vadd.f32 %v864_v2, %v2953_v40  ;;  %v2358_v26 = vpop.eup %2357  ;;  %v3368_v52 = vmul.f32 %v1270_v37, %v1206_v34  ;;  %2365 = vrcp.f32 %v3359_v41  ;;  %v3371_v19 = vmul.f32 0.5, %v862_v58 }
 0x290   : > { %3986 = vst [vmem:[#allocation67_spill] sm:$0xff] %v3365_v8  ;;  %v1000_v30 = vand.u32 2147483647, %v3362_v0  ;;  %v3374_v35 = vpop.eup %2359  ;;  %v3376_v47 = vmul.f32 %v1251_v27, %v1187_v20  ;;  %v1125_v32 = vmul.f32 %v2358_v26, %v3340_v23  ;;  %v1639_v39 = vmul.f32 %v1607_v25, %v999_v28  ;;  %v867_v20 = vpop.f32.mrf.mxu0 }
 0x291   : > { %3987 = vst [vmem:[#allocation68_spill] sm:$0xff] %v3371_v19  ;;  %v3379_v53 = vmul.f32 0.70710677, %v865_v7  ;;  %v3381_v2 = vpop.eup %2361  ;;  %v1252_v34 = vsub.f32 2.0, %v1220_v46  ;;  %2367 = vpow2.f32 %v1681_v36  ;;  %v1272_v61 = vsub.f32 2.0, %v1240_v63 }
 0x292   : > { %3988 = vst [vmem:[#allocation69_spill] sm:$0xff] %v3374_v35  ;;  %v1032_v10 = vmul.f32 0.3275911, %v1000_v30  ;;  %v1608_v37 = vsub.f32 0.0, %v1000_v30  ;;  %v1157_v49 = vsub.f32 2.0, %v1125_v32  ;;  %2369 = vpow2.f32 %v1683_v24 }
 0x293   : > { %3989 = vst [vmem:[#allocation70_spill] sm:$0xff] %v3376_v47  ;;  %v2364_v58 = vpop.eup %2363  ;;  %v1001_v13 = vand.u32 2147483647, %v3379_v53  ;;  %v930_v25 = vadd.f32 %v929_v1, %v2953_v40  ;;  %v1685_v47 = vmul.f32 1.442695, %v1639_v39  ;;  %v868_v24 = vadd.f32 %v867_v20, %v2910_v11 }
 0x294   : > { %3990 = vst [vmem:[#allocation71_spill] sm:$0xff] %v3379_v53  ;;  %v1126_v27 = vmul.f32 %v2364_v58, %v3352_v18  ;;  %v3385_v19 = vadd.f32 1.0, %v1032_v10  ;;  %v1640_v28 = vmul.f32 %v1608_v37, %v1000_v30  ;;  %v1189_v16 = vmul.f32 %v2358_v26, %v1157_v49 }
 0x295   : > { %v1033_v46 = vmul.f32 0.3275911, %v1001_v13  ;;  %v1609_v36 = vsub.f32 0.0, %v1001_v13  ;;  %v2366_v8 = vpop.eup %2365  ;;  %v3389_v63 = vmul.f32 0.70710677, %v930_v25  ;;  %v3399_v39 = vmul.f32 0.5, %v3343_v14 }
 0x296   : > { %v1158_v35 = vsub.f32 2.0, %v1126_v27  ;;  %2371 = vrcp.f32 %v3385_v19  ;;  %v1221_v32 = vmul.f32 %v1189_v16, %v3340_v23  ;;  %v1127_v10 = vmul.f32 %v2366_v8, %v3359_v41 }
 0x297   : > { %v3394_v53 = vadd.f32 1.0, %v1033_v46  ;;  %v1641_v30 = vmul.f32 %v1609_v36, %v1001_v13  ;;  %v3396_v40 = vpop.eup %2367  ;;  %v1687_v26 = vmul.f32 1.442695, %v1640_v28  ;;  %3992 = vst [vmem:[#allocation73_spill] sm:$0xff] %v3399_v39  ;;  %v1002_v1 = vand.u32 2147483647, %v3389_v63 }
 0x298   : > { %3991 = vst [vmem:[#allocation72_spill] sm:$0xff] %v3396_v40  ;;  %v1190_v49 = vmul.f32 %v2364_v58, %v1158_v35  ;;  %v3402_v37 = vpop.eup %2369  ;;  %v3405_v20 = vmul.f32 %v1252_v34, %v3350_v33  ;;  %v3407_v23 = vmul.f32 %v1272_v61, %v1208_v3  ;;  %v1159_v27 = vsub.f32 2.0, %v1127_v10  ;;  %v932_v40 = vpop.f32.mrf.mxu1 }
 0x299   : > { %3993 = vst [vmem:[#allocation74_spill] sm:$0xff] %v3402_v37  ;;  %2373 = vrcp.f32 %v3394_v53  ;;  %v1253_v13 = vsub.f32 2.0, %v1221_v32  ;;  %v1034_v35 = vmul.f32 0.3275911, %v1002_v1  ;;  %v1610_v58 = vsub.f32 0.0, %v1002_v1 }
 0x29a   : > { %v1222_v46 = vmul.f32 %v1190_v49, %v3352_v18  ;;  %v1191_v28 = vmul.f32 %v2366_v8, %v1159_v27  ;;  %2375 = vpow2.f32 %v1685_v47  ;;  %v1689_v14 = vmul.f32 1.442695, %v1641_v30 }
 0x29b   : > { %v3411_v36 = vmul.f32 0.70710677, %v868_v24  ;;  %2377 = vpow2.f32 %v1687_v26  ;;  %v3413_v33 = vmul.f32 0.5, %v865_v7  ;;  %v3415_v3 = vadd.f32 1.0, %v1034_v35 }
 0x29c   : > { %v2372_v39 = vpop.eup %2371  ;;  %v1254_v37 = vsub.f32 2.0, %v1222_v46  ;;  %v1642_v61 = vmul.f32 %v1610_v58, %v1002_v1  ;;  %v3418_v32 = vmul.f32 0.5, %v930_v25  ;;  %v3421_v8 = vmul.f32 %v1253_v13, %v1189_v16  ;;  %v870_v46 = vpop.f32.mrf.mxu0 }
 0x29d   : > { %3994 = vst [vmem:[#allocation75_spill] sm:$0xff] %v3411_v36  ;;  %v1128_v34 = vmul.f32 %v2372_v39, %v3385_v19  ;;  %v1003_v18 = vand.u32 2147483647, %v3411_v36  ;;  %v1223_v47 = vmul.f32 %v1191_v28, %v3359_v41  ;;  %2379 = vrcp.f32 %v3415_v3 }
 0x29e   : > { %3995 = vst [vmem:[#allocation76_spill] sm:$0xff] %v3413_v33  ;;  %v933_v10 = vadd.f32 %v932_v40, %v2910_v11  ;;  %2381 = vpow2.f32 %v1689_v14  ;;  %v3426_v35 = vmul.f32 %v1254_v37, %v1190_v49  ;;  %v3429_v1 = vmul.f32 0.5, %v868_v24 }
 0x29f   : > { %3996 = vst [vmem:[#allocation77_spill] sm:$0xff] %v3418_v32  ;;  %v2374_v30 = vpop.eup %2373  ;;  %v1160_v7 = vsub.f32 2.0, %v1128_v34  ;;  %v1035_v26 = vmul.f32 0.3275911, %v1003_v18  ;;  %v1611_v27 = vsub.f32 0.0, %v1003_v18  ;;  %v1255_v14 = vsub.f32 2.0, %v1223_v47 }
 0x2a0   : > { %3997 = vst [vmem:[#allocation78_spill] sm:$0xff] %v3421_v8  ;;  %v1129_v25 = vmul.f32 %v2374_v30, %v3394_v53  ;;  %v3431_v16 = vmul.f32 0.70710677, %v933_v10  ;;  %v3433_v13 = vpop.eup %2375  ;;  %v1691_v58 = vmul.f32 1.442695, %v1642_v61  ;;  %v871_v37 = vadd.f32 %v870_v46, %v2916_v57 }
 0x2a1   : > { %3998 = vst [vmem:[#allocation79_spill] sm:$0xff] %v3429_v1  ;;  %v1192_v41 = vmul.f32 %v2372_v39, %v1160_v7  ;;  %v3435_v33 = vadd.f32 1.0, %v1035_v26  ;;  %v1643_v11 = vmul.f32 %v1611_v27, %v1003_v18  ;;  %v3437_v40 = vpop.eup %2377  ;;  %v3449_v57 = vmul.f32 0.5, %v933_v10 }
 0x2a2   : > { %3999 = vst [vmem:[#allocation80_spill] sm:$0xff] %v3433_v13  ;;  %v1161_v34 = vsub.f32 2.0, %v1129_v25  ;;  %v1004_v49 = vand.u32 2147483647, %v3431_v16  ;;  %v1335_v13 = vmul.f32 1.0614054, %v3332_v31 }
 0x2a3   : > { %4000 = vst [vmem:[#allocation81_spill] sm:$0xff] %v3437_v40  ;;  %v1224_v24 = vmul.f32 %v1192_v41, %v3385_v19  ;;  %2383 = vrcp.f32 %v3435_v33  ;;  %v1693_v1 = vmul.f32 1.442695, %v1643_v11  ;;  %v2380_v39 = vpop.eup %2379  ;;  %v3444_v18 = vmul.f32 0.70710677, %v871_v37 }
 0x2a4   : > { %v1193_v61 = vmul.f32 %v2374_v30, %v1161_v34  ;;  %v1036_v7 = vmul.f32 0.3275911, %v1004_v49  ;;  %v1612_v26 = vsub.f32 0.0, %v1004_v49  ;;  %v3446_v27 = vpop.eup %2381  ;;  %v1130_v25 = vmul.f32 %v2380_v39, %v3415_v3  ;;  %4003 = vst [vmem:[#allocation84_spill] sm:$0xff] %v3449_v57 }
 0x2a5   : > { %4001 = vst [vmem:[#allocation82_spill] sm:$0xff] %v3444_v18  ;;  %v1256_v47 = vsub.f32 2.0, %v1224_v24  ;;  %2385 = vpow2.f32 %v1691_v58  ;;  %v1005_v8 = vand.u32 2147483647, %v3444_v18  ;;  %v3455_v30 = vmul.f32 %v1255_v14, %v1191_v28 }
 0x2a6   : > { %4002 = vst [vmem:[#allocation83_spill] sm:$0xff] %v3446_v27  ;;  %v1225_v19 = vmul.f32 %v1193_v61, %v3394_v53  ;;  %v3452_v46 = vadd.f32 1.0, %v1036_v7  ;;  %v1644_v11 = vmul.f32 %v1612_v26, %v1004_v49  ;;  %v1162_v34 = vsub.f32 2.0, %v1130_v25 }
 0x2a7   : > { %4004 = vst [vmem:[#allocation85_spill] sm:$0xff] %v3455_v30  ;;  %2387 = vpow2.f32 %v1693_v1  ;;  %v2199_v36 = vadd.f32 -1.4531521, %v1335_v13  ;;  %v1037_v24 = vmul.f32 0.3275911, %v1005_v8  ;;  %v3458_v27 = vmul.f32 0.5, %v871_v37 }
 0x2a8   : > { %v1257_v40 = vsub.f32 2.0, %v1225_v19  ;;  %2389 = vrcp.f32 %v3452_v46  ;;  %v1194_v58 = vmul.f32 %v2380_v39, %v1162_v34  ;;  %v1613_v32 = vsub.f32 0.0, %v1005_v8 }
 0x2a9   : > { %4005 = vst [vmem:[#allocation86_spill] sm:$0xff] %v3458_v27  ;;  %v2384_v10 = vpop.eup %2383  ;;  %v1399_v53 = vmul.f32 %v2199_v36, %v3332_v31  ;;  %v1333_v49 = vmul.f32 1.0614054, %v3292_v42  ;;  %v3462_v7 = vmul.f32 %v1256_v47, %v1192_v41  ;;  %v1695_v14 = vmul.f32 1.442695, %v1644_v11 }
 0x2aa   : > { %v1131_v28 = vmul.f32 %v2384_v10, %v3435_v33  ;;  %v3465_v1 = vadd.f32 1.0, %v1037_v24  ;;  %v1226_v26 = vmul.f32 %v1194_v58, %v3415_v3  ;;  %v1645_v37 = vmul.f32 %v1613_v32, %v1005_v8 }
 0x2ab   : > { %v3467_v13 = vpop.eup %2385  ;;  %v1431_v25 = vadd.f32 1.4214138, %v1399_v53  ;;  %v2197_v19 = vadd.f32 -1.4531521, %v1333_v49  ;;  %v1331_v36 = vmul.f32 1.0614054, %v3230_v15  ;;  %v3475_v34 = vmul.f32 %v1257_v40, %v1193_v61 }
 0x2ac   : > { %v1163_v39 = vsub.f32 2.0, %v1131_v28  ;;  %2391 = vrcp.f32 %v3465_v1  ;;  %v1329_v41 = vmul.f32 1.0614054, %v3164_v5  ;;  %v1258_v11 = vsub.f32 2.0, %v1226_v26 }
 0x2ad   : > { %v3473_v47 = vpop.eup %2387  ;;  %4007 = vst [vmem:[#allocation88_spill] sm:$0xff] %v3475_v34  ;;  %v1463_v24 = vmul.f32 %v1431_v25, %v3332_v31  ;;  %v1397_v27 = vmul.f32 %v2197_v19, %v3292_v42  ;;  %v2195_v8 = vadd.f32 -1.4531521, %v1331_v36  ;;  %v1327_v49 = vmul.f32 1.0614054, %v3093_v21 }
 0x2ae   : > { %4006 = vst [vmem:[#allocation87_spill] sm:$0xff] %v3473_v47  ;;  %v2390_v3 = vpop.eup %2389  ;;  %v1195_v32 = vmul.f32 %v2384_v10, %v1163_v39  ;;  %v2193_v53 = vadd.f32 -1.4531521, %v1329_v41  ;;  %2393 = vpow2.f32 %v1695_v14  ;;  %v1697_v30 = vmul.f32 1.442695, %v1645_v37 }
 0x2af   : > { %v1132_v28 = vmul.f32 %v2390_v3, %v3452_v46  ;;  %v2231_v18 = vadd.f32 -0.28449672, %v1463_v24  ;;  %v1429_v40 = vadd.f32 1.4214138, %v1397_v27  ;;  %v1395_v61 = vmul.f32 %v2195_v8, %v3230_v15 }
 0x2b0   : > { %v1227_v47 = vmul.f32 %v1195_v32, %v3435_v33  ;;  %v1393_v26 = vmul.f32 %v2193_v53, %v3164_v5  ;;  %v3484_v25 = vmul.f32 %v1258_v11, %v1194_v58  ;;  %v2191_v39 = vadd.f32 -1.4531521, %v1327_v49 }
 0x2b1   : > { %v1164_v19 = vsub.f32 2.0, %v1132_v28  ;;  %v1527_v10 = vmul.f32 %v2231_v18, %v3332_v31  ;;  %v1461_v41 = vmul.f32 %v1429_v40, %v3292_v42  ;;  %v1427_v34 = vadd.f32 1.4214138, %v1395_v61 }
 0x2b2   : > { %v2392_v36 = vpop.eup %2391  ;;  %v1425_v14 = vadd.f32 1.4214138, %v1393_v26  ;;  %v1336_v37 = vmul.f32 1.0614054, %v3407_v23  ;;  %v1391_v8 = vmul.f32 %v2191_v39, %v3093_v21  ;;  %vm1815_vm15 = vcmp.ge.f32.partialorder %v3224_v48, 0.0 }
 0x2b3   : > { %v1196_v24 = vmul.f32 %v2390_v3, %v1164_v19  ;;  %v1133_v33 = vmul.f32 %v2392_v36, %v3465_v1  ;;  %v1559_v27 = vadd.f32 0.2548296, %v1527_v10  ;;  %v1259_v58 = vsub.f32 2.0, %v1227_v47 }
 0x2b4   : > { %v2229_v11 = vadd.f32 -0.28449672, %v1461_v41  ;;  %v1459_v18 = vmul.f32 %v1427_v34, %v3230_v15  ;;  %v1457_v53 = vmul.f32 %v1425_v14, %v3164_v5  ;;  %v3494_v49 = vpop.eup %2393  ;;  %v1423_v61 = vadd.f32 1.4214138, %v1391_v8 }
 0x2b5   : > { %v1228_v28 = vmul.f32 %v1196_v24, %v3452_v46  ;;  %v1165_v40 = vsub.f32 2.0, %v1133_v33  ;;  %v1591_v3 = vmul.f32 %v1559_v27, %v3332_v31  ;;  %v2200_v39 = vadd.f32 -1.4531521, %v1336_v37 }
 0x2b6   : > { %v1525_v26 = vmul.f32 %v2229_v11, %v3292_v42  ;;  %v2227_v19 = vadd.f32 -0.28449672, %v1459_v18  ;;  %v2225_v10 = vadd.f32 -0.28449672, %v1457_v53  ;;  %2395 = vpow2.f32 %v1697_v30 }
 0x2b7   : > { %v1260_v57 = vsub.f32 2.0, %v1228_v28  ;;  %v1751_v47 = vmul.f32 %v3321_v62, %v1591_v3  ;;  %v1455_v34 = vmul.f32 %v1423_v61, %v3093_v21  ;;  %v1400_v33 = vmul.f32 %v2200_v39, %v3407_v23 }
 0x2b8   : > { %v1557_v41 = vadd.f32 0.2548296, %v1525_v26  ;;  %v1523_v14 = vmul.f32 %v2227_v19, %v3230_v15  ;;  %v1521_v46 = vmul.f32 %v2225_v10, %v3164_v5  ;;  %vm1813_vm0 = vcmp.ge.f32.partialorder %v3154_v44, 0.0 }
 0x2b9   : > { %v3505_v31 = vmul.f32 %v1259_v58, %v1195_v32  ;;  %v3507_v27 = vmul.f32 %v2392_v36, %v1165_v40  ;;  %v1783_v37 = vsub.f32 1.0, %v1751_v47  ;;  %v2223_v8 = vadd.f32 -0.28449672, %v1455_v34 }
 0x2ba   : > { %v1589_v30 = vmul.f32 %v1557_v41, %v3292_v42  ;;  %v1555_v62 = vadd.f32 0.2548296, %v1523_v14  ;;  %v1553_v11 = vadd.f32 0.2548296, %v1521_v46  ;;  %v1432_v18 = vadd.f32 1.4214138, %v1400_v33 }
 0x2bb   : > { %vm1809_vm1 = vcmp.ge.f32.partialorder %v2993_v9, 0.0  ;;  %vm1811_vm2 = vcmp.ge.f32.partialorder %v3049_v38, 0.0  ;;  %v3512_v53 = vmul.f32 %v1260_v57, %v1196_v24  ;;  %v1847_v28 = vsub.f32 0.0, %v1783_v37 }
 0x2bc   : > { %v1519_v3 = vmul.f32 %v2223_v8, %v3093_v21  ;;  %v1334_v32 = vmul.f32 1.0614054, %v3368_v52  ;;  %v1749_v36 = vmul.f32 %v3256_v50, %v1589_v30  ;;  %v1587_v58 = vmul.f32 %v1555_v62, %v3230_v15  ;;  %v3520_v61 = vpop.eup %2395 }
 0x2bd   : > { %v1585_v42 = vmul.f32 %v1553_v11, %v3164_v5  ;;  %v1464_v40 = vmul.f32 %v1432_v18, %v3407_v23  ;;  %v3524_v26 = vmul.f32 %v3507_v27, %v3465_v1  ;;  %v1879_v57 = vsel %vm1815_vm15, %v1783_v37, %v1847_v28 }
 0x2be   : > { %v1551_v24 = vadd.f32 0.2548296, %v1519_v3  ;;  %v2198_v19 = vadd.f32 -1.4531521, %v1334_v32  ;;  %v1943_v50 = vadd.f32 1.0, %v1879_v57  ;;  %v1781_v10 = vsub.f32 1.0, %v1749_v36 }
 0x2bf   : > { %v1747_v15 = vmul.f32 %v3192_v43, %v1587_v58  ;;  %v1745_v5 = vmul.f32 %v3124_v56, %v1585_v42  ;;  %v2232_v47 = vadd.f32 -0.28449672, %v1464_v40  ;;  %v1332_v1 = vmul.f32 1.0614054, %v3299_v59 }
 0x2c0   : > { %v1583_v39 = vmul.f32 %v1551_v24, %v3093_v21  ;;  %v1398_v34 = vmul.f32 %v2198_v19, %v3368_v52  ;;  %v1975_v48 = vmul.f32 %v1943_v50, %v3260_v17  ;;  %v1845_v41 = vsub.f32 0.0, %v1781_v10 }
 0x2c1   : > { %v1779_v14 = vsub.f32 1.0, %v1747_v15  ;;  %v1777_v46 = vsub.f32 1.0, %v1745_v5  ;;  %v1528_v37 = vmul.f32 %v2232_v47, %v3407_v23  ;;  %v2196_v43 = vadd.f32 -1.4531521, %v1332_v1 }
 0x2c2   : > { %v1743_v33 = vmul.f32 %v3045_v60, %v1583_v39  ;;  %v1430_v8 = vadd.f32 1.4214138, %v1398_v34  ;;  %1997 = vmatpush.msrb.mxu2 %v1975_v48  ;;  %v1877_v21 = vsel %vm1813_vm0, %v1781_v10, %v1845_v41  ;;  %v1330_v62 = vmul.f32 1.0614054, %v3239_v6 }
 0x2c3   : > { %v1843_v56 = vsub.f32 0.0, %v1779_v14  ;;  %v1841_v30 = vsub.f32 0.0, %v1777_v46  ;;  %v1941_v11 = vadd.f32 1.0, %v1877_v21  ;;  %v1560_v17 = vadd.f32 0.2548296, %v1528_v37 }
 0x2c4   : > { %v1775_v18 = vsub.f32 1.0, %v1743_v33  ;;  %v1462_v28 = vmul.f32 %v1430_v8, %v3368_v52  ;;  %v1396_v32 = vmul.f32 %v2196_v43, %v3299_v59  ;;  %v2194_v36 = vadd.f32 -1.4531521, %v1330_v62 }
 0x2c5   : > { %v1875_v60 = vsel %vm1811_vm2, %v1779_v14, %v1843_v56  ;;  %v1873_v3 = vsel %vm1809_vm1, %v1777_v46, %v1841_v30  ;;  %vm1816_vm4 = vcmp.ge.f32.partialorder %v3285_v4, 0.0  ;;  %v1973_v44 = vmul.f32 %v1941_v11, %v3211_v55  ;;  %v4008_v46 = vld [vmem:[#allocation45_spill] sm:$0xff] }
 0x2c6   : > { %v1939_v58 = vadd.f32 1.0, %v1875_v60  ;;  %v1937_v42 = vadd.f32 1.0, %v1873_v3  ;;  %v1839_v40 = vsub.f32 0.0, %v1775_v18  ;;  %v1592_v57 = vmul.f32 %v1560_v17, %v3407_v23  ;;  %v4009_v17 = vld [vmem:[#allocation64_spill] sm:$0xff] }
 0x2c7   : > { %v2230_v24 = vadd.f32 -0.28449672, %v1462_v28  ;;  %v1428_v19 = vadd.f32 1.4214138, %v1396_v32  ;;  %v1394_v38 = vmul.f32 %v2194_v36, %v3239_v6  ;;  %v1261_v50 = vsub.f32 2.0, %v3524_v26  ;;  %1998 = vmatpush.msrb.mxu2 %v1973_v44  ;;  %v4010_v32 = vld [vmem:[#allocation33_spill] sm:$0xff] }
 0x2c8   : > { %v1971_v9 = vmul.f32 %v1939_v58, %v3149_v12  ;;  %v1871_v10 = vsel %vm1807_vm3, %v1775_v18, %v1839_v40  ;;  %v1328_v15 = vmul.f32 1.0614054, %v3173_v22  ;;  %v1752_v5 = vmul.f32 %v3381_v2, %v1592_v57 }
 0x2c9   : > { %v1935_v55 = vadd.f32 1.0, %v1871_v10  ;;  %v1526_v39 = vmul.f32 %v2230_v24, %v3368_v52  ;;  %v1460_v23 = vmul.f32 %v1428_v19, %v3299_v59  ;;  %v1969_v47 = vmul.f32 %v1937_v42, %v3064_v54  ;;  %v4011_v24 = vld [vmem:[#allocation62_spill] sm:$0xff] }
 0x2ca   : > { %1999 = vmatpush.msrb.mxu2 %v1971_v9  ;;  %v1426_v34 = vadd.f32 1.4214138, %v1394_v38  ;;  %v2192_v1 = vadd.f32 -1.4531521, %v1328_v15  ;;  %v1326_v48 = vmul.f32 1.0614054, %v3112_v29 }
 0x2cb   : > { %v1967_v12 = vmul.f32 %v1935_v55, %v3005_v51  ;;  %v1784_v45 = vsub.f32 1.0, %v1752_v5  ;;  %v1558_v41 = vadd.f32 0.2548296, %v1526_v39  ;;  %v2228_v14 = vadd.f32 -0.28449672, %v1460_v23  ;;  %v4012_v15 = vld [vmem:[#allocation25_spill] sm:$0xff] }
 0x2cc   : > { %vm1814_vm5 = vcmp.ge.f32.partialorder %v4008_v46, 0.0  ;;  %2000 = vmatpush.msrb.mxu2 %v1969_v47  ;;  %v1458_v2 = vmul.f32 %v1426_v34, %v3239_v6  ;;  %v1392_v33 = vmul.f32 %v2192_v1, %v3173_v22  ;;  %v2190_v37 = vadd.f32 -1.4531521, %v1326_v48  ;;  %v4013_v5 = vld [vmem:[#allocation51_spill] sm:$0xff] }
 0x2cd   : > { %v1324_v8 = vmul.f32 1.0614054, %v3512_v53  ;;  %v1848_v54 = vsub.f32 0.0, %v1784_v45  ;;  %v1590_v43 = vmul.f32 %v1558_v41, %v3368_v52  ;;  %v1524_v21 = vmul.f32 %v2228_v14, %v3299_v59 }
 0x2ce   : > { %v1322_v51 = vmul.f32 1.0614054, %v3484_v25  ;;  %2001 = vmatpush.msrb.mxu2 %v1967_v12  ;;  %v2226_v56 = vadd.f32 -0.28449672, %v1458_v2  ;;  %v1424_v30 = vadd.f32 1.4214138, %v1392_v33  ;;  %v1390_v62 = vmul.f32 %v2190_v37, %v3112_v29 }
 0x2cf   : > { %v2188_v11 = vadd.f32 -1.4531521, %v1324_v8  ;;  %v1880_v18 = vsel %vm1816_vm4, %v1784_v45, %v1848_v54  ;;  %v1750_v28 = vmul.f32 %v4009_v17, %v1590_v43  ;;  %v1556_v60 = vadd.f32 0.2548296, %v1524_v21  ;;  %v4014_v33 = vld [vmem:[#allocation40_spill] sm:$0xff]  ;;  %v4017_v17 = vld [vmem:[#allocation6_spill] sm:$0xff] }
 0x2d0   : > { %v2186_v3 = vadd.f32 -1.4531521, %v1322_v51  ;;  %vm1812_vm6 = vcmp.ge.f32.partialorder %v4010_v32, 0.0  ;;  %v1944_v52 = vadd.f32 1.0, %v1880_v18  ;;  %v1522_v36 = vmul.f32 %v2226_v56, %v3239_v6  ;;  %v4016_v56 = vld [vmem:[#allocation52_spill] sm:$0xff] }
 0x2d1   : > { %v1456_v44 = vmul.f32 %v1424_v30, %v3173_v22  ;;  %v1422_v58 = vadd.f32 1.4214138, %v1390_v62  ;;  %v1782_v42 = vsub.f32 1.0, %v1750_v28  ;;  %v1588_v40 = vmul.f32 %v1556_v60, %v3299_v59  ;;  %v4019_v32 = vld [vmem:[#allocation44_spill] sm:$0xff] }
 0x2d2   : > { %v1388_v57 = vmul.f32 %v2188_v11, %v3512_v53  ;;  %v1386_v4 = vmul.f32 %v2186_v3, %v3484_v25  ;;  %v1976_v19 = vmul.f32 %v1944_v52, %v4011_v24  ;;  %v1554_v38 = vadd.f32 0.2548296, %v1522_v36  ;;  %v4018_v52 = vld [vmem:[#allocation30_spill] sm:$0xff] }
 0x2d3   : > { %v2224_v9 = vadd.f32 -0.28449672, %v1456_v44  ;;  %v1454_v10 = vmul.f32 %v1422_v58, %v3112_v29  ;;  %vm1810_vm7 = vcmp.ge.f32.partialorder %v4012_v15, 0.0  ;;  %v1846_v55 = vsub.f32 0.0, %v1782_v42 }
 0x2d4   : > { %v1748_v39 = vmul.f32 %v4013_v5, %v1588_v40  ;;  %v1420_v23 = vadd.f32 1.4214138, %v1388_v57  ;;  %v1418_v47 = vadd.f32 1.4214138, %v1386_v4  ;;  %2026 = vmatpush.msrb.mxu3 %v1976_v19  ;;  %v1586_v59 = vmul.f32 %v1554_v38, %v3239_v6  ;;  %v4015_v6 = vld [vmem:[#allocation10_spill] sm:$0xff]  ;;  %v4020_v19 = vld [vmem:[#allocation19_spill] sm:$0xff] }
 0x2d5   : > { %v1520_v34 = vmul.f32 %v2224_v9, %v3173_v22  ;;  %v2222_v1 = vadd.f32 -0.28449672, %v1454_v10  ;;  %v1320_v48 = vmul.f32 1.0614054, %v3462_v7  ;;  %v1878_v12 = vsel %vm1814_vm5, %v1782_v42, %v1846_v55 }
 0x2d6   : > { %v1780_v45 = vsub.f32 1.0, %v1748_v39  ;;  %v1452_v41 = vmul.f32 %v1420_v23, %v3512_v53  ;;  %v1450_v14 = vmul.f32 %v1418_v47, %v3484_v25  ;;  %v1942_v2 = vadd.f32 1.0, %v1878_v12 }
 0x2d7   : > { %v1746_v37 = vmul.f32 %v4014_v33, %v1586_v59  ;;  %v1552_v8 = vadd.f32 0.2548296, %v1520_v34  ;;  %v1518_v54 = vmul.f32 %v2222_v1, %v3112_v29  ;;  %vm1808_vm8 = vcmp.ge.f32.partialorder %v4015_v6, 0.0  ;;  %v4021_v59 = vld [vmem:[#allocation32_spill] sm:$0xff] }
 0x2d8   : > { %v3595_v43 = vmul.f32 %v1261_v50, %v3507_v27  ;;  %v1844_v46 = vsub.f32 0.0, %v1780_v45  ;;  %v2220_v21 = vadd.f32 -0.28449672, %v1452_v41  ;;  %v2218_v51 = vadd.f32 -0.28449672, %v1450_v14 }
 0x2d9   : > { %v1974_v30 = vmul.f32 %v1942_v2, %v4016_v56  ;;  %v1778_v62 = vsub.f32 1.0, %v1746_v37  ;;  %v1584_v11 = vmul.f32 %v1552_v8, %v3173_v22  ;;  %v1550_v18 = vadd.f32 0.2548296, %v1518_v54  ;;  %v4022_v54 = vld [vmem:[#allocation22_spill] sm:$0xff] }
 0x2da   : > { %vm1806_vm9 = vcmp.ge.f32.partialorder %v4017_v17, 0.0  ;;  %v1876_v28 = vsel %vm1812_vm6, %v1780_v45, %v1844_v46  ;;  %v1516_v60 = vmul.f32 %v2220_v21, %v3512_v53  ;;  %v1514_v26 = vmul.f32 %v2218_v51, %v3484_v25 }
 0x2db   : > { %v2184_v27 = vadd.f32 -1.4531521, %v1320_v48  ;;  %2027 = vmatpush.msrb.mxu3 %v1974_v30  ;;  %v1940_v50 = vadd.f32 1.0, %v1876_v28  ;;  %v1842_v3 = vsub.f32 0.0, %v1778_v62  ;;  %v1744_v36 = vmul.f32 %v4018_v52, %v1584_v11 }
 0x2dc   : > { %v1582_v44 = vmul.f32 %v1550_v18, %v3112_v29  ;;  %v1548_v58 = vadd.f32 0.2548296, %v1516_v60  ;;  %v1546_v22 = vadd.f32 0.2548296, %v1514_v26  ;;  %v1318_v40 = vmul.f32 1.0614054, %v3426_v35 }
 0x2dd   : > { %v1384_v42 = vmul.f32 %v2184_v27, %v3462_v7  ;;  %vm1802_vm10 = vcmp.ge.f32.partialorder %v3389_v63, 0.0  ;;  %vm1804_vm11 = vcmp.ge.f32.partialorder %v3431_v16, 0.0  ;;  %v1972_v57 = vmul.f32 %v1940_v50, %v4019_v32  ;;  %v4023_v18 = vld [vmem:[#allocation12_spill] sm:$0xff]  ;;  %v4026_v63 = vld [vmem:[#allocation77_spill] sm:$0xff] }
 0x2de   : > { %v1874_v4 = vsel %vm1810_vm7, %v1778_v62, %v1842_v3  ;;  %v1776_v24 = vsub.f32 1.0, %v1744_v36  ;;  %v1742_v38 = vmul.f32 %v4020_v19, %v1582_v44  ;;  %v1580_v29 = vmul.f32 %v1548_v58, %v3512_v53 }
 0x2df   : > { %v1938_v9 = vadd.f32 1.0, %v1874_v4  ;;  %v1578_v10 = vmul.f32 %v1546_v22, %v3484_v25  ;;  %v1416_v55 = vadd.f32 1.4214138, %v1384_v42  ;;  %2028 = vmatpush.msrb.mxu3 %v1972_v57  ;;  %v2182_v23 = vadd.f32 -1.4531521, %v1318_v40  ;;  %v4024_v22 = vld [vmem:[#allocation60_spill] sm:$0xff] }
 0x2e0   : > { %v1840_v5 = vsub.f32 0.0, %v1776_v24  ;;  %v1774_v39 = vsub.f32 1.0, %v1742_v38  ;;  %v1325_v47 = vmul.f32 1.0614054, %v3595_v43  ;;  %v1740_v15 = vmul.f32 %v3494_v49, %v1580_v29  ;;  %v4025_v42 = vld [vmem:[#allocation84_spill] sm:$0xff]  ;;  %v4027_v29 = vld [vmem:[#allocation81_spill] sm:$0xff] }
 0x2e1   : > { %v1970_v34 = vmul.f32 %v1938_v9, %v4021_v59  ;;  %v1738_v1 = vmul.f32 %v3467_v13, %v1578_v10  ;;  %v1448_v48 = vmul.f32 %v1416_v55, %v3462_v7  ;;  %v1382_v25 = vmul.f32 %v2182_v23, %v3426_v35  ;;  %v4029_v23 = vld [vmem:[#allocation50_spill] sm:$0xff]  ;;  %v4030_v59 = vld [vmem:[#allocation61_spill] sm:$0xff] }
 0x2e2   : > { %v1872_v53 = vsel %vm1808_vm8, %v1776_v24, %v1840_v5  ;;  %v1838_v12 = vsub.f32 0.0, %v1774_v39  ;;  %v2189_v45 = vadd.f32 -1.4531521, %v1325_v47  ;;  %v1772_v14 = vsub.f32 1.0, %v1740_v15  ;;  %v4028_v5 = vld [vmem:[#allocation88_spill] sm:$0xff] }
 0x2e3   : > { %2029 = vmatpush.msrb.mxu3 %v1970_v34  ;;  %v1936_v41 = vadd.f32 1.0, %v1872_v53  ;;  %v1770_v2 = vsub.f32 1.0, %v1738_v1  ;;  %v2216_v33 = vadd.f32 -0.28449672, %v1448_v48  ;;  %v1414_v49 = vadd.f32 1.4214138, %v1382_v25 }
 0x2e4   : > { %v1870_v37 = vsel %vm1806_vm9, %v1774_v39, %v1838_v12  ;;  %v1389_v13 = vmul.f32 %v2189_v45, %v3595_v43  ;;  %v1316_v8 = vmul.f32 1.0614054, %v3405_v20  ;;  %v1836_v21 = vsub.f32 0.0, %v1772_v14 }
 0x2e5   : > { %v1968_v6 = vmul.f32 %v1936_v41, %v4022_v54  ;;  %v1934_v46 = vadd.f32 1.0, %v1870_v37  ;;  %v1834_v51 = vsub.f32 0.0, %v1770_v2  ;;  %v1512_v56 = vmul.f32 %v2216_v33, %v3462_v7  ;;  %v4031_v33 = vld [vmem:[#allocation82_spill] sm:$0xff] }
 0x2e6   : > { %v1446_v30 = vmul.f32 %v1414_v49, %v3426_v35  ;;  %v1421_v62 = vadd.f32 1.4214138, %v1389_v13  ;;  %v2180_v11 = vadd.f32 -1.4531521, %v1316_v8  ;;  %v1868_v28 = vsel %vm1804_vm11, %v1772_v14, %v1836_v21  ;;  %v4032_v49 = vld [vmem:[#allocation74_spill] sm:$0xff] }
 0x2e7   : > { %2030 = vmatpush.msrb.mxu3 %v1968_v6  ;;  %v1966_v17 = vmul.f32 %v1934_v46, %v4023_v18  ;;  %v1866_v60 = vsel %vm1802_vm10, %v1770_v2, %v1834_v51  ;;  %v1323_v26 = vmul.f32 1.0614054, %v3505_v31  ;;  %v1932_v27 = vadd.f32 1.0, %v1868_v28 }
 0x2e8   : > { %v1930_v50 = vadd.f32 1.0, %v1866_v60  ;;  %v1544_v3 = vadd.f32 0.2548296, %v1512_v56  ;;  %v2214_v52 = vadd.f32 -0.28449672, %v1446_v30  ;;  %vm1800_vm12 = vcmp.ge.f32.partialorder %v3362_v0, 0.0 }
 0x2e9   : > { %2031 = vmatpush.msrb.mxu3 %v1966_v17  ;;  %v1453_v36 = vmul.f32 %v1421_v62, %v3595_v43  ;;  %v1380_v44 = vmul.f32 %v2180_v11, %v3405_v20  ;;  %v2187_v58 = vadd.f32 -1.4531521, %v1323_v26  ;;  %v1314_v16 = vmul.f32 1.0614054, %v4024_v22  ;;  %v4033_v60 = vld [vmem:[#allocation53_spill] sm:$0xff] }
 0x2ea   : > { %v1964_v40 = vmul.f32 %v1932_v27, %v4025_v42  ;;  %v1962_v32 = vmul.f32 %v1930_v50, %v4026_v63  ;;  %v1576_v57 = vmul.f32 %v1544_v3, %v3462_v7  ;;  %v1510_v4 = vmul.f32 %v2214_v52, %v3426_v35  ;;  %v4034_v3 = vld [vmem:[#allocation73_spill] sm:$0xff] }
 0x2eb   : > { %v2221_v24 = vadd.f32 -0.28449672, %v1453_v36  ;;  %v1412_v19 = vadd.f32 1.4214138, %v1380_v44  ;;  %v1387_v38 = vmul.f32 %v2187_v58, %v3505_v31  ;;  %v2178_v9 = vadd.f32 -1.4531521, %v1314_v16 }
 0x2ec   : > { %2032 = vmatpush.msrb.mxu3 %v1964_v40  ;;  %v1736_v10 = vmul.f32 %v4027_v29, %v1576_v57  ;;  %v1542_v55 = vadd.f32 0.2548296, %v1510_v4  ;;  %v1321_v39 = vmul.f32 1.0614054, %v4028_v5  ;;  %v1312_v47 = vmul.f32 1.0614054, %v4029_v23 }
 0x2ed   : > { %vm1798_vm13 = vcmp.ge.f32.partialorder %v4030_v59, 0.0  ;;  %v1517_v34 = vmul.f32 %v2221_v24, %v3595_v43  ;;  %v1444_v7 = vmul.f32 %v1412_v19, %v3405_v20  ;;  %v1419_v15 = vadd.f32 1.4214138, %v1387_v38  ;;  %v4035_v58 = vld [vmem:[#allocation75_spill] sm:$0xff]  ;;  %v4036_v57 = vld [vmem:[#allocation69_spill] sm:$0xff] }
 0x2ee   : > { %v1378_v1 = vmul.f32 %v2178_v9, %v4024_v22  ;;  %2033 = vmatpush.msrb.mxu3 %v1962_v32  ;;  %v1768_v48 = vsub.f32 1.0, %v1736_v10  ;;  %v1574_v53 = vmul.f32 %v1542_v55, %v3426_v35  ;;  %v2185_v12 = vadd.f32 -1.4531521, %v1321_v39  ;;  %v4037_v9 = vld [vmem:[#allocation85_spill] sm:$0xff]  ;;  %v4038_v10 = vld [vmem:[#allocation39_spill] sm:$0xff] }
 0x2ef   : > { %v2176_v25 = vadd.f32 -1.4531521, %v1312_v47  ;;  %v1549_v45 = vadd.f32 0.2548296, %v1517_v34  ;;  %v2212_v41 = vadd.f32 -0.28449672, %v1444_v7  ;;  %v1451_v14 = vmul.f32 %v1419_v15, %v3505_v31 }
 0x2f0   : > { %v1410_v2 = vadd.f32 1.4214138, %v1378_v1  ;;  %vm1805_vm14 = vcmp.ge.f32.partialorder %v4031_v33, 0.0  ;;  %v1832_v37 = vsub.f32 0.0, %v1768_v48  ;;  %v1734_v13 = vmul.f32 %v4032_v49, %v1574_v53  ;;  %v4039_v55 = vld [vmem:[#allocation67_spill] sm:$0xff]  ;;  %v4044_v33 = vld [vmem:[#allocation86_spill] sm:$0xff] }
 0x2f1   : > { %v1385_v8 = vmul.f32 %v2185_v12, %v4028_v5  ;;  %v1376_v54 = vmul.f32 %v2176_v25, %v4029_v23  ;;  %v1581_v6 = vmul.f32 %v1549_v45, %v3595_v43  ;;  %v1508_v35 = vmul.f32 %v2212_v41, %v3405_v20  ;;  %v4040_v34 = vld [vmem:[#allocation87_spill] sm:$0xff]  ;;  %v4045_v49 = vld [vmem:[#allocation56_spill] sm:$0xff] }
 0x2f2   : > { %v2219_v46 = vadd.f32 -0.28449672, %v1451_v14  ;;  %v1442_v21 = vmul.f32 %v1410_v2, %v4024_v22  ;;  %v1864_v51 = vsel %vm1800_vm12, %v1768_v48, %v1832_v37  ;;  %v1766_v56 = vsub.f32 1.0, %v1734_v13  ;;  %v4041_v53 = vld [vmem:[#allocation71_spill] sm:$0xff]  ;;  %v4043_v2 = vld [vmem:[#allocation28_spill] sm:$0xff] }
 0x2f3   : > { %v1417_v30 = vadd.f32 1.4214138, %v1385_v8  ;;  %v1408_v62 = vadd.f32 1.4214138, %v1376_v54  ;;  %v1928_v11 = vadd.f32 1.0, %v1864_v51  ;;  %v1741_v18 = vmul.f32 %v3520_v61, %v1581_v6  ;;  %v4042_v41 = vld [vmem:[#allocation43_spill] sm:$0xff] }
 0x2f4   : > { %v1540_v17 = vadd.f32 0.2548296, %v1508_v35  ;;  %v1515_v28 = vmul.f32 %v2219_v46, %v3505_v31  ;;  %vm1796_vm15 = vcmp.ge.f32.partialorder %v4033_v60, 0.0  ;;  %v1830_v43 = vsub.f32 0.0, %v1766_v56  ;;  %v4049_v60 = vld [vmem:[#allocation58_spill] sm:$0xff] }
 0x2f5   : > { %v2210_v26 = vadd.f32 -0.28449672, %v1442_v21  ;;  %v1449_v27 = vmul.f32 %v1417_v30, %v4028_v5  ;;  %v1440_v50 = vmul.f32 %v1408_v62, %v4029_v23  ;;  %v1960_v0 = vmul.f32 %v1928_v11, %v4034_v3  ;;  %v4047_v62 = vld [vmem:[#allocation46_spill] sm:$0xff] }
 0x2f6   : > { %v1773_v52 = vsub.f32 1.0, %v1741_v18  ;;  %v1572_v36 = vmul.f32 %v1540_v17, %v3405_v20  ;;  %v1547_v44 = vadd.f32 0.2548296, %v1515_v28  ;;  %vm1803_vm0 = vcmp.ge.f32.partialorder %v4035_v58, 0.0  ;;  %v4048_v17 = vld [vmem:[#allocation78_spill] sm:$0xff] }
 0x2f7   : > { %v1862_v61 = vsel %vm1798_vm13, %v1766_v56, %v1830_v43  ;;  %v1506_v16 = vmul.f32 %v2210_v26, %v4024_v22  ;;  %v2217_v42 = vadd.f32 -0.28449672, %v1449_v27  ;;  %v2208_v40 = vadd.f32 -0.28449672, %v1440_v50  ;;  %2034 = vmatpush.msrb.mxu3 %v1960_v0  ;;  %v4046_v56 = vld [vmem:[#allocation83_spill] sm:$0xff] }
 0x2f8   : > { %v1926_v63 = vadd.f32 1.0, %v1862_v61  ;;  %v1837_v32 = vsub.f32 0.0, %v1773_v52  ;;  %v1732_v4 = vmul.f32 %v4036_v57, %v1572_v36  ;;  %v1579_v24 = vmul.f32 %v1547_v44, %v3505_v31  ;;  %v4050_v44 = vld [vmem:[#allocation79_spill] sm:$0xff] }
 0x2f9   : > { %v1538_v19 = vadd.f32 0.2548296, %v1506_v16  ;;  %v1513_v20 = vmul.f32 %v2217_v42, %v4028_v5  ;;  %v1504_v38 = vmul.f32 %v2208_v40, %v4029_v23  ;;  %v1319_v29 = vmul.f32 1.0614054, %v4037_v9  ;;  %v4051_v42 = vld [vmem:[#allocation31_spill] sm:$0xff] }
 0x2fa   : > { %vm1794_vm1 = vcmp.ge.f32.partialorder %v4038_v10, 0.0  ;;  %v1958_v39 = vmul.f32 %v1926_v63, %v4039_v55  ;;  %v1869_v47 = vsel %vm1805_vm14, %v1773_v52, %v1837_v32  ;;  %v1764_v59 = vsub.f32 1.0, %v1732_v4  ;;  %v4053_v55 = vld [vmem:[#allocation47_spill] sm:$0xff] }
 0x2fb   : > { %v1739_v7 = vmul.f32 %v4040_v34, %v1579_v24  ;;  %v1933_v15 = vadd.f32 1.0, %v1869_v47  ;;  %v1570_v31 = vmul.f32 %v1538_v19, %v4024_v22  ;;  %v1545_v1 = vadd.f32 0.2548296, %v1513_v20 }
 0x2fc   : > { %v1536_v48 = vadd.f32 0.2548296, %v1504_v38  ;;  %vm1801_vm2 = vcmp.ge.f32.partialorder %v4041_v53, 0.0  ;;  %2035 = vmatpush.msrb.mxu3 %v1958_v39  ;;  %v1828_v12 = vsub.f32 0.0, %v1764_v59  ;;  %v2183_v45 = vadd.f32 -1.4531521, %v1319_v29 }
 0x2fd   : > { %v1771_v25 = vsub.f32 1.0, %v1739_v7  ;;  %v1310_v14 = vmul.f32 1.0614054, %v4042_v41  ;;  %vm1792_vm3 = vcmp.ge.f32.partialorder %v4043_v2, 0.0  ;;  %v1965_v37 = vmul.f32 %v1933_v15, %v4044_v33  ;;  %v4052_v38 = vld [vmem:[#allocation70_spill] sm:$0xff] }
 0x2fe   : > { %v1730_v13 = vmul.f32 %v4045_v49, %v1570_v31  ;;  %v1577_v8 = vmul.f32 %v1545_v1, %v4028_v5  ;;  %v1568_v22 = vmul.f32 %v1536_v48, %v4029_v23  ;;  %v1860_v54 = vsel %vm1796_vm15, %v1764_v59, %v1828_v12  ;;  %v4054_v1 = vld [vmem:[#allocation76_spill] sm:$0xff]  ;;  %v4057_v33 = vld [vmem:[#allocation38_spill] sm:$0xff] }
 0x2ff   : > { %v1835_v6 = vsub.f32 0.0, %v1771_v25  ;;  %v1383_v35 = vmul.f32 %v2183_v45, %v4037_v9  ;;  %v2174_v46 = vadd.f32 -1.4531521, %v1310_v14  ;;  %2002 = vmatpush.msrb.mxu2 %v1965_v37  ;;  %v1924_v21 = vadd.f32 1.0, %v1860_v54  ;;  %v4056_v14 = vld [vmem:[#allocation63_spill] sm:$0xff] }
 0x300   : > { %v1762_v51 = vsub.f32 1.0, %v1730_v13  ;;  %v1737_v30 = vmul.f32 %v4046_v56, %v1577_v8  ;;  %v1728_v11 = vmul.f32 %v4047_v62, %v1568_v22  ;;  %v1317_v28 = vmul.f32 1.0614054, %v4048_v17  ;;  %v4059_v56 = vld [vmem:[#allocation49_spill] sm:$0xff]  ;;  %v4060_v62 = vld [vmem:[#allocation18_spill] sm:$0xff] }
 0x301   : > { %v1867_v18 = vsel %vm1803_vm0, %v1771_v25, %v1835_v6  ;;  %v1415_v5 = vadd.f32 1.4214138, %v1383_v35  ;;  %v1374_v23 = vmul.f32 %v2174_v46, %v4042_v41  ;;  %v1956_v43 = vmul.f32 %v1924_v21, %v4049_v60  ;;  %v4055_v25 = vld [vmem:[#allocation21_spill] sm:$0xff] }
 0x302   : > { %v1931_v26 = vadd.f32 1.0, %v1867_v18  ;;  %v1826_v27 = vsub.f32 0.0, %v1762_v51  ;;  %v1769_v50 = vsub.f32 1.0, %v1737_v30  ;;  %v1760_v3 = vsub.f32 1.0, %v1728_v11  ;;  %v4058_v6 = vld [vmem:[#allocation57_spill] sm:$0xff]  ;;  %v4061_v11 = vld [vmem:[#allocation80_spill] sm:$0xff] }
 0x303   : > { %v1447_v0 = vmul.f32 %v1415_v5, %v4037_v9  ;;  %v1406_v52 = vadd.f32 1.4214138, %v1374_v23  ;;  %v2181_v36 = vadd.f32 -1.4531521, %v1317_v28  ;;  %2036 = vmatpush.msrb.mxu3 %v1956_v43  ;;  %v1308_v40 = vmul.f32 1.0614054, %v4051_v42 }
 0x304   : > { %v1963_v61 = vmul.f32 %v1931_v26, %v4050_v44  ;;  %v1858_v58 = vsel %vm1794_vm1, %v1762_v51, %v1826_v27  ;;  %v1833_v16 = vsub.f32 0.0, %v1769_v50  ;;  %v1824_v32 = vsub.f32 0.0, %v1760_v3 }
 0x305   : > { %v1922_v63 = vadd.f32 1.0, %v1858_v58  ;;  %v2215_v57 = vadd.f32 -0.28449672, %v1447_v0  ;;  %v1438_v4 = vmul.f32 %v1406_v52, %v4042_v41  ;;  %v1381_v19 = vmul.f32 %v2181_v36, %v4048_v17  ;;  %v4062_v52 = vld [vmem:[#allocation35_spill] sm:$0xff] }
 0x306   : > { %2003 = vmatpush.msrb.mxu2 %v1963_v61  ;;  %v1865_v24 = vsel %vm1801_vm2, %v1769_v50, %v1833_v16  ;;  %v2172_v20 = vadd.f32 -1.4531521, %v1308_v40  ;;  %v1315_v29 = vmul.f32 1.0614054, %v4052_v38  ;;  %v1856_v47 = vsel %vm1792_vm3, %v1760_v3, %v1824_v32  ;;  %v4063_v16 = vld [vmem:[#allocation59_spill] sm:$0xff] }
 0x307   : > { %v1954_v10 = vmul.f32 %v1922_v63, %v4053_v55  ;;  %v1929_v39 = vadd.f32 1.0, %v1865_v24  ;;  %v1511_v59 = vmul.f32 %v2215_v57, %v4037_v9  ;;  %v1920_v34 = vadd.f32 1.0, %v1856_v47 }
 0x308   : > { %v2206_v7 = vadd.f32 -0.28449672, %v1438_v4  ;;  %v1413_v15 = vadd.f32 1.4214138, %v1381_v19  ;;  %v1372_v31 = vmul.f32 %v2172_v20, %v4051_v42  ;;  %v2179_v12 = vadd.f32 -1.4531521, %v1315_v29 }
 0x309   : > { %2037 = vmatpush.msrb.mxu3 %v1954_v10  ;;  %v1961_v48 = vmul.f32 %v1929_v39, %v4054_v1  ;;  %v1543_v53 = vadd.f32 0.2548296, %v1511_v59  ;;  %v1306_v45 = vmul.f32 1.0614054, %v4055_v25  ;;  %vm1799_vm4 = vcmp.ge.f32.partialorder %v4056_v14, 0.0  ;;  %v4064_v20 = vld [vmem:[#allocation9_spill] sm:$0xff] }
 0x30a   : > { %v1952_v37 = vmul.f32 %v1920_v34, %v4057_v33  ;;  %v1502_v2 = vmul.f32 %v2206_v7, %v4042_v41  ;;  %v1445_v49 = vmul.f32 %v1413_v15, %v4048_v17  ;;  %v1404_v13 = vadd.f32 1.4214138, %v1372_v31  ;;  %v4065_v34 = vld [vmem:[#allocation72_spill] sm:$0xff] }
 0x30b   : > { %2004 = vmatpush.msrb.mxu2 %v1961_v48  ;;  %v1575_v8 = vmul.f32 %v1543_v53, %v4037_v9  ;;  %v1379_v22 = vmul.f32 %v2179_v12, %v4052_v38  ;;  %v2170_v54 = vadd.f32 -1.4531521, %v1306_v45  ;;  %v1313_v35 = vmul.f32 1.0614054, %v4058_v6  ;;  %v4066_v53 = vld [vmem:[#allocation48_spill] sm:$0xff] }
 0x30c   : > { %2038 = vmatpush.msrb.mxu3 %v1952_v37  ;;  %v1534_v46 = vadd.f32 0.2548296, %v1502_v2  ;;  %v2213_v21 = vadd.f32 -0.28449672, %v1445_v49  ;;  %v1436_v51 = vmul.f32 %v1404_v13, %v4051_v42  ;;  %v1311_v30 = vmul.f32 1.0614054, %v4059_v56 }
 0x30d   : > { %vm1790_vm5 = vcmp.ge.f32.partialorder %v4060_v62, 0.0  ;;  %v1735_v18 = vmul.f32 %v4061_v11, %v1575_v8  ;;  %v1411_v5 = vadd.f32 1.4214138, %v1379_v22  ;;  %v1370_v23 = vmul.f32 %v2170_v54, %v4055_v25  ;;  %v4067_v12 = vld [vmem:[#allocation68_spill] sm:$0xff]  ;;  %v4068_v37 = vld [vmem:[#allocation23_spill] sm:$0xff]  ;;  %v4069_v22 = vld [vmem:[#allocation5_spill] sm:$0xff] }
 0x30e   : > { %v2177_v9 = vadd.f32 -1.4531521, %v1313_v35  ;;  %v1566_v28 = vmul.f32 %v1534_v46, %v4042_v41  ;;  %v1509_v60 = vmul.f32 %v2213_v21, %v4048_v17  ;;  %v2204_v43 = vadd.f32 -0.28449672, %v1436_v51  ;;  %v4070_v21 = vld [vmem:[#allocation41_spill] sm:$0xff] }
 0x30f   : > { %v2175_v26 = vadd.f32 -1.4531521, %v1311_v30  ;;  %v1767_v27 = vsub.f32 1.0, %v1735_v18  ;;  %v1443_v50 = vmul.f32 %v1411_v5, %v4052_v38  ;;  %v1402_v3 = vadd.f32 1.4214138, %v1370_v23  ;;  %v4071_v30 = vld [vmem:[#allocation27_spill] sm:$0xff] }
 0x310   : > { %v1377_v0 = vmul.f32 %v2177_v9, %v4058_v6  ;;  %v1726_v36 = vmul.f32 %v4062_v52, %v1566_v28  ;;  %v1541_v44 = vadd.f32 0.2548296, %v1509_v60  ;;  %v1500_v61 = vmul.f32 %v2204_v43, %v4051_v42  ;;  %v4072_v11 = vld [vmem:[#allocation65_spill] sm:$0xff] }
 0x311   : > { %v1375_v58 = vmul.f32 %v2175_v26, %v4059_v56  ;;  %vm1797_vm6 = vcmp.ge.f32.partialorder %v4063_v16, 0.0  ;;  %v1831_v41 = vsub.f32 0.0, %v1767_v27  ;;  %v2211_v40 = vadd.f32 -0.28449672, %v1443_v50 }
 0x312   : > { %v1434_v63 = vmul.f32 %v1402_v3, %v4055_v25  ;;  %v1409_v32 = vadd.f32 1.4214138, %v1377_v0  ;;  %v1758_v57 = vsub.f32 1.0, %v1726_v36  ;;  %v1573_v4 = vmul.f32 %v1541_v44, %v4048_v17  ;;  %v4074_v36 = vld [vmem:[#allocation29_spill] sm:$0xff] }
 0x313   : > { %v1532_v24 = vadd.f32 0.2548296, %v1500_v61  ;;  %v1407_v19 = vadd.f32 1.4214138, %v1375_v58  ;;  %vm1788_vm7 = vcmp.ge.f32.partialorder %v4064_v20, 0.0  ;;  %v1863_v29 = vsel %vm1799_vm4, %v1767_v27, %v1831_v41  ;;  %v4073_v27 = vld [vmem:[#allocation16_spill] sm:$0xff] }
 0x314   : > { %v1507_v55 = vmul.f32 %v2211_v40, %v4052_v38  ;;  %v2202_v10 = vadd.f32 -0.28449672, %v1434_v63  ;;  %v1441_v39 = vmul.f32 %v1409_v32, %v4058_v6  ;;  %v1927_v47 = vadd.f32 1.0, %v1863_v29  ;;  %v4075_v61 = vld [vmem:[#allocation26_spill] sm:$0xff] }
 0x315   : > { %v1822_v59 = vsub.f32 0.0, %v1758_v57  ;;  %v1733_v7 = vmul.f32 %v4065_v34, %v1573_v4  ;;  %v1564_v15 = vmul.f32 %v1532_v24, %v4051_v42  ;;  %v1439_v48 = vmul.f32 %v1407_v19, %v4059_v56  ;;  %v4076_v58 = vld [vmem:[#allocation66_spill] sm:$0xff]  ;;  %v4078_v19 = vld [vmem:[#allocation13_spill] sm:$0xff] }
 0x316   : > { %v1539_v31 = vadd.f32 0.2548296, %v1507_v55  ;;  %v1498_v17 = vmul.f32 %v2202_v10, %v4055_v25  ;;  %v2209_v1 = vadd.f32 -0.28449672, %v1441_v39  ;;  %vm1795_vm8 = vcmp.ge.f32.partialorder %v4066_v53, 0.0  ;;  %v4077_v32 = vld [vmem:[#allocation54_spill] sm:$0xff] }
 0x317   : > { %v1959_v45 = vmul.f32 %v1927_v47, %v4067_v12  ;;  %v1854_v14 = vsel %vm1790_vm5, %v1758_v57, %v1822_v59  ;;  %v1765_v33 = vsub.f32 1.0, %v1733_v7  ;;  %v1724_v2 = vmul.f32 %v4068_v37, %v1564_v15  ;;  %v4079_v10 = vld [vmem:[#allocation20_spill] sm:$0xff]  ;;  %v4080_v34 = vld [vmem:[#allocation42_spill] sm:$0xff]  ;;  %v4082_v53 = vld [vmem:[#allocation55_spill] sm:$0xff] }
 0x318   : > { %v1918_v49 = vadd.f32 1.0, %v1854_v14  ;;  %v1571_v13 = vmul.f32 %v1539_v31, %v4052_v38  ;;  %v1530_v42 = vadd.f32 0.2548296, %v1498_v17  ;;  %v1505_v8 = vmul.f32 %v2209_v1, %v4058_v6  ;;  %v4081_v31 = vld [vmem:[#allocation3_spill] sm:$0xff]  ;;  %v4083_v37 = vld [vmem:[#allocation37_spill] sm:$0xff] }
 0x319   : > { %vm1786_vm9 = vcmp.ge.f32.partialorder %v4069_v22, 0.0  ;;  %2005 = vmatpush.msrb.mxu2 %v1959_v45  ;;  %v1829_v54 = vsub.f32 0.0, %v1765_v33  ;;  %v1756_v35 = vsub.f32 1.0, %v1724_v2  ;;  %v2207_v46 = vadd.f32 -0.28449672, %v1439_v48 }
 0x31a   : > { %v1309_v51 = vmul.f32 1.0614054, %v4070_v21  ;;  %v1950_v62 = vmul.f32 %v1918_v49, %v4071_v30  ;;  %v1731_v18 = vmul.f32 %v4072_v11, %v1571_v13  ;;  %v1562_v5 = vmul.f32 %v1530_v42, %v4055_v25  ;;  %v4084_v42 = vld [vmem:[#allocation36_spill] sm:$0xff] }
 0x31b   : > { %v1537_v23 = vadd.f32 0.2548296, %v1505_v8  ;;  %v1861_v38 = vsel %vm1797_vm6, %v1765_v33, %v1829_v54  ;;  %v1820_v9 = vsub.f32 0.0, %v1756_v35  ;;  %v1503_v28 = vmul.f32 %v2207_v46, %v4059_v56  ;;  %v3793_v54 = vld [vmem:[%s3856_s4] sm:$0xff] }
 0x31c   : > { %v2173_v60 = vadd.f32 -1.4531521, %v1309_v51  ;;  %2039 = vmatpush.msrb.mxu3 %v1950_v62  ;;  %v1925_v43 = vadd.f32 1.0, %v1861_v38  ;;  %v1763_v26 = vsub.f32 1.0, %v1731_v18  ;;  %v1722_v50 = vmul.f32 %v4073_v27, %v1562_v5  ;;  %v4085_v18 = vld [vmem:[#allocation11_spill] sm:$0xff]  ;;  %v4087_v27 = vld [vmem:[#allocation17_spill] sm:$0xff] }
 0x31d   : > { %v1569_v3 = vmul.f32 %v1537_v23, %v4058_v6  ;;  %v1852_v0 = vsel %vm1788_vm7, %v1756_v35, %v1820_v9  ;;  %v1535_v52 = vadd.f32 0.2548296, %v1503_v28  ;;  %v1307_v44 = vmul.f32 1.0614054, %v4074_v36  ;;  %v4086_v23 = vld [vmem:[#allocation24_spill] sm:$0xff] }
 0x31e   : > { %v1373_v25 = vmul.f32 %v2173_v60, %v4070_v21  ;;  %vm1791_vm10 = vcmp.ge.f32.partialorder %v4075_v61, 0.0  ;;  %v1957_v16 = vmul.f32 %v1925_v43, %v4076_v58  ;;  %v1916_v41 = vadd.f32 1.0, %v1852_v0 }
 0x31f   : > { %v1827_v40 = vsub.f32 0.0, %v1763_v26  ;;  %v1754_v63 = vsub.f32 1.0, %v1722_v50  ;;  %v1729_v57 = vmul.f32 %v4077_v32, %v1569_v3  ;;  %v1567_v4 = vmul.f32 %v1535_v52, %v4059_v56 }
 0x320   : > { %v1405_v6 = vadd.f32 1.4214138, %v1373_v25  ;;  %v2171_v24 = vadd.f32 -1.4531521, %v1307_v44  ;;  %2006 = vmatpush.msrb.mxu2 %v1957_v16  ;;  %v1948_v20 = vmul.f32 %v1916_v41, %v4078_v19  ;;  %v1305_v39 = vmul.f32 1.0614054, %v4079_v10 }
 0x321   : > { %v1859_v29 = vsel %vm1795_vm8, %v1763_v26, %v1827_v40  ;;  %v1818_v55 = vsub.f32 0.0, %v1754_v63  ;;  %v1761_v59 = vsub.f32 1.0, %v1729_v57  ;;  %v1727_v7 = vmul.f32 %v4080_v34, %v1567_v4  ;;  %v4088_v44 = vld [vmem:[#allocation34_spill] sm:$0xff]  ;;  %v367_v16 = vld [vmem:[%s3856_s4 + $0x8] sm:$0xff] }
 0x322   : > { %v1923_v47 = vadd.f32 1.0, %v1859_v29  ;;  %v1437_v15 = vmul.f32 %v1405_v6, %v4070_v21  ;;  %2040 = vmatpush.msrb.mxu3 %v1948_v20  ;;  %v1882_v17 = vmul.f32 0.5, %v4081_v31  ;;  %v1371_v1 = vmul.f32 %v2171_v24, %v4074_v36  ;;  %v4089_v6 = vld [vmem:[#allocation15_spill] sm:$0xff] }
 0x323   : > { %v1850_v56 = vsel %vm1786_vm9, %v1754_v63, %v1818_v55  ;;  %v2169_v48 = vadd.f32 -1.4531521, %v1305_v39  ;;  %v1825_v14 = vsub.f32 0.0, %v1761_v59  ;;  %v1759_v33 = vsub.f32 1.0, %v1727_v7  ;;  %v4090_v55 = vld [vmem:[#allocation14_spill] sm:$0xff]  ;;  %v4091_v7 = vld [vmem:[#allocation8_spill] sm:$0xff] }
 0x324   : > { %v1955_v12 = vmul.f32 %v1923_v47, %v4082_v53  ;;  %v1914_v45 = vadd.f32 1.0, %v1850_v56  ;;  %vm1793_vm11 = vcmp.ge.f32.partialorder %v4083_v37, 0.0  ;;  %v2205_v2 = vadd.f32 -0.28449672, %v1437_v15  ;;  %v368_v56 = vld [vmem:[%s3856_s4 + $0x10] sm:$0xff] }
 0x325   : > { %v1403_v49 = vadd.f32 1.4214138, %v1371_v1  ;;  %v1369_v13 = vmul.f32 %v2169_v48, %v4079_v10  ;;  %v1889_v8 = vmul.f32 0.5, %v4084_v42  ;;  %v1857_v35 = vsel %vm1793_vm11, %v1761_v59, %v1825_v14  ;;  %v4093_v53 = vld [vmem:[#allocation4_spill] sm:$0xff]  ;;  %v4094_v14 = vld [vmem:[#allocation2_spill] sm:$0xff] }
 0x326   : > { %2007 = vmatpush.msrb.mxu2 %v1955_v12  ;;  %v1946_v22 = vmul.f32 %v1914_v45, %v1882_v17  ;;  %v1823_v46 = vsub.f32 0.0, %v1759_v33  ;;  %v1921_v51 = vadd.f32 1.0, %v1857_v35  ;;  %v1501_v30 = vmul.f32 %v2205_v2, %v4070_v21  ;;  %v4092_v17 = vld [vmem:[#allocation7_spill] sm:$0xff] }
 0x327   : > { %v1435_v62 = vmul.f32 %v1403_v49, %v4074_v36  ;;  %v1401_v11 = vadd.f32 1.4214138, %v1369_v13  ;;  %v1657_v5 = vmul.f32 1.442695, %v4085_v18  ;;  %v1887_v38 = vmul.f32 0.5, %v4086_v23  ;;  %v369_v49 = vld [vmem:[%s3856_s4 + $0x18] sm:$0xff]  ;;  %v1980_v13 = vpop.permute.xlu0 %1979 }
 0x328   : > { %2041 = vmatpush.msrb.mxu3 %v1946_v22  ;;  %v1855_v9 = vsel %vm1791_vm10, %v1759_v33, %v1823_v46  ;;  %v1953_v28 = vmul.f32 %v1921_v51, %v1889_v8  ;;  %v1533_v43 = vadd.f32 0.2548296, %v1501_v30  ;;  %2397 = vpow2.f32 %v4087_v27  ;;  %v2401_v22 = vld [vmem:[%s2483_s30 + $0x8] sm:$0xff]  ;;  %v2402_v30 = vld [vmem:[%s2483_s30 + $0x18] sm:$0xff]  ;;  %v2404_v27 = vld [vmem:[%s2483_s30] sm:$0xff] }
 0x329   : > { %2042 = vmatmul.f32.vlgmr.msrb.gmra.mxu3 %v3793_v54  ;;  %v1919_v60 = vadd.f32 1.0, %v1855_v9  ;;  %v2203_v26 = vadd.f32 -0.28449672, %v1435_v62  ;;  %v1433_v50 = vmul.f32 %v1401_v11, %v4079_v10  ;;  %2399 = vpow2.f32 %v1657_v5  ;;  %v1990_v11 = vpop.permute.xlu2 %1989  ;;  %v2403_v23 = vld [vmem:[%s2483_s30 + $0x28] sm:$0xff] }
 0x32a   : > { %2008 = vmatpush.msrb.mxu2 %v1953_v28  ;;  %v1565_v0 = vmul.f32 %v1533_v43, %v4070_v21  ;;  %vm1789_vm12 = vcmp.ge.f32.partialorder %v4089_v6, 0.0  ;;  %v1885_v39 = vmul.f32 0.5, %v4090_v55  ;;  %vm1787_vm13 = vcmp.ge.f32.partialorder %v4091_v7, 0.0 }
 0x32b   : > { %v1951_v3 = vmul.f32 %v1919_v60, %v1887_v38  ;;  %v1499_v52 = vmul.f32 %v2203_v26, %v4074_v36  ;;  %v2201_v25 = vadd.f32 -0.28449672, %v1433_v50  ;;  %v1883_v1 = vmul.f32 0.5, %v4092_v17 }
 0x32c   : > { %v1725_v61 = vmul.f32 %v4088_v44, %v1565_v0  ;;  %vm1785_vm14 = vcmp.ge.f32.partialorder %v4093_v53, 0.0  ;;  %v1881_v33 = vmul.f32 0.5, %v4094_v14  ;;  %v2406_v44 = vld [vmem:[%s2483_s30 + $0x10] sm:$0xff] }
 0x32d   : > { %2009 = vmatpush.msrb.mxu2 %v1951_v3  ;;  %v1531_v58 = vadd.f32 0.2548296, %v1499_v52  ;;  %v1497_v41 = vmul.f32 %v2201_v25, %v4079_v10  ;;  %v2405_v3 = vld [vmem:[%s2483_s30 + $0x38] sm:$0xff] }
 0x32e   : > { %v1757_v40 = vsub.f32 1.0, %v1725_v61  ;;  %v2398_v32 = vpop.eup %2397 }
 0x32f   : > { %v1563_v63 = vmul.f32 %v1531_v58, %v4074_v36  ;;  %v1529_v57 = vadd.f32 0.2548296, %v1497_v41  ;;  %v2400_v19 = vpop.eup %2399  ;;  %v1995_v28 = vpop.permute.xlu0 %1994  ;;  %v2407_v41 = vld [vmem:[%s2483_s30 + $0x20] sm:$0xff] }
 0x330   : > { %v1821_v21 = vsub.f32 0.0, %v1757_v40 }
 0x331   : > { %v1723_v4 = vmul.f32 %v2398_v32, %v1563_v63  ;;  %2045 = vmatmul.f32.gmra.mxu3 %v367_v16  ;;  %v1561_v24 = vmul.f32 %v1529_v57, %v4079_v10  ;;  %v2408_v57 = vld [vmem:[%s2483_s30 + $0x30] sm:$0xff] }
 0x332   : > { %v1853_v20 = vsel %vm1789_vm12, %v1757_v40, %v1821_v21 }
 0x333   : > { %v1755_v29 = vsub.f32 1.0, %v1723_v4  ;;  %v1917_v47 = vadd.f32 1.0, %v1853_v20  ;;  %v1721_v59 = vmul.f32 %v2400_v19, %v1561_v24 }
 0x335   : > { %v1819_v34 = vsub.f32 0.0, %v1755_v29  ;;  %v1949_v36 = vmul.f32 %v1917_v47, %v1885_v39  ;;  %v1753_v15 = vsub.f32 1.0, %v1721_v59 }
 0x337   : > { %v1851_v31 = vsel %vm1787_vm13, %v1755_v29, %v1819_v34  ;;  %2010 = vmatpush.msrb.mxu2 %v1949_v36  ;;  %v1817_v48 = vsub.f32 0.0, %v1753_v15 }
 0x338   : > { %v1915_v10 = vadd.f32 1.0, %v1851_v31 }
 0x339   : > { %2048 = vmatmul.f32.gmra.mxu3 %v368_v56  ;;  %v1849_v45 = vsel %vm1785_vm14, %v1753_v15, %v1817_v48 }
 0x33a   : > { %v1947_v12 = vmul.f32 %v1915_v10, %v1883_v1  ;;  %v1913_v37 = vadd.f32 1.0, %v1849_v45 }
 0x33c   : > { %2011 = vmatpush.msrb.mxu2 %v1947_v12  ;;  %v1945_v2 = vmul.f32 %v1913_v37, %v1881_v33 }
 0x33e   : > { %2012 = vmatpush.msrb.mxu2 %v1945_v2 }
 0x33f   : > { %2013 = vmatmul.f32.vlgmr.msrb.gmra.mxu2 %v3793_v54  ;;  %v1985_v54 = vpop.permute.xlu1 %1984 }
 0x341   : > { %2051 = vmatmul.f32.gmra.mxu3 %v369_v49 }
 0x347   : > { %2016 = vmatmul.f32.gmra.mxu2 %v367_v16 }
 0x34f   : > { %2019 = vmatmul.f32.gmra.mxu2 %v368_v56 }
 0x357   : > { %2022 = vmatmul.f32.gmra.mxu2 %v369_v49 }
 0x3ac   : > { %v2043_v42 = vpop.f32.mrf.mxu3 }
 0x3ad   : > { %v2044_v8 = vadd.f32 %v2043_v42, %v1980_v13 }
 0x3af   : > { %v2056_v35 = vadd.f32 %v2401_v22, %v2044_v8 }
 0x3b1   : > { %2064 = vst [vmem:[%s3831_s15 + $0x8] sm:$0xff] %v2056_v35 }
 0x3b4   : > { %v2046_v46 = vpop.f32.mrf.mxu3 }
 0x3b5   : > { %v2047_v51 = vadd.f32 %v2046_v46, %v1985_v54 }
 0x3b7   : > { %v2058_v62 = vadd.f32 %v2402_v30, %v2047_v51 }
 0x3b9   : > { %2066 = vst [vmem:[%s3831_s15 + $0x18] sm:$0xff] %v2058_v62 }
 0x3bc   : > { %v2049_v18 = vpop.f32.mrf.mxu3 }
 0x3bd   : > { %v2050_v5 = vadd.f32 %v2049_v18, %v1990_v11 }
 0x3bf   : > { %v2060_v38 = vadd.f32 %v2403_v23, %v2050_v5 }
 0x3c1   : > { %2068 = vst [vmem:[%s3831_s15 + $0x28] sm:$0xff] %v2060_v38 }
 0x3c2   : > { %v2014_v9 = vpop.f32.mrf.mxu2 }
 0x3c3   : > { %v2015_v60 = vadd.f32 %v2014_v9, %v1980_v13 }
 0x3c4   : > { %v2052_v43 = vpop.f32.mrf.mxu3 }
 0x3c5   : > { %v2053_v26 = vadd.f32 %v2052_v43, %v1995_v28  ;;  %v2055_v50 = vadd.f32 %v2404_v27, %v2015_v60 }
 0x3c7   : > { %v2062_v0 = vadd.f32 %v2405_v3, %v2053_v26  ;;  %2063 = vst [vmem:[%s3831_s15] sm:$0xff] %v2055_v50 }
 0x3c9   : > { %2070 = vst [vmem:[%s3831_s15 + $0x38] sm:$0xff] %v2062_v0 }
 0x3ca   : > { %v2017_v52 = vpop.f32.mrf.mxu2 }
 0x3cb   : > { %v2018_v25 = vadd.f32 %v2017_v52, %v1985_v54 }
 0x3cd   : > { %v2057_v61 = vadd.f32 %v2406_v44, %v2018_v25 }
 0x3cf   : > { %2065 = vst [vmem:[%s3831_s15 + $0x10] sm:$0xff] %v2057_v61 }
 0x3d2   : > { %v2020_v58 = vpop.f32.mrf.mxu2 }
 0x3d3   : > { %v2021_v16 = vadd.f32 %v2020_v58, %v1990_v11 }
 0x3d5   : > { %v2059_v40 = vadd.f32 %v2407_v41, %v2021_v16 }
 0x3d7   : > { %2067 = vst [vmem:[%s3831_s15 + $0x20] sm:$0xff] %v2059_v40 }
 0x3da   : > { %v2023_v63 = vpop.f32.mrf.mxu2 }
 0x3db   : > { %v2024_v32 = vadd.f32 %v2023_v63, %v1995_v28 }
 0x3dd   : > { %v2061_v21 = vadd.f32 %v2408_v57, %v2024_v32 }
 0x3df   : > { %2069 = vst [vmem:[%s3831_s15 + $0x30] sm:$0xff] %v2061_v21 }
 0x3e0 PF: > { %s16_s21 = sadd.s32 1, %s2415_s21  }
 0x3e1   : > { %p13_p4 = scmp.ge.s32.totalorder %s16_s21, 4  }
 0x3e3   :  { %15 = sbr.rel (!%p13_p4) target bundleno = 1 (0x1), region = 76 }

</bundles_post_ra>
